<compile_context>
chip_gen: v7x
topology: tpu7x:2x2x1
jax: 0.10.0
libtpu: 0.0.40
codegen_flags: <defaults>
</compile_context>

<pallas_src>
import functools
import math

import jax
import jax.numpy as jnp
from jax import lax
from jax.experimental import pallas as pl
from jax.experimental.pallas import tpu as pltpu


def _round_up(n, m):
    return ((n + m - 1) // m) * m


# -----------------------------------------------------------------------------
# Bidirectional LSTM: per-direction kernel (grid axis = direction, "parallel")
# -----------------------------------------------------------------------------
def _lstm_dir_kernel(T, Bp, x_ref, wih_ref, whh_ref, b_ref, hn_ref, xp_scr):
    H = whh_ref.shape[1]

    # Hoisted (time-parallel) input projection: ONE (T*Bp, I) @ (I, 4H) matmul.
    xp_scr[...] = (jnp.dot(x_ref[0], wih_ref[0], preferred_element_type=jnp.float32)
                   + b_ref[0])

    whh = whh_ref[0]                                   # (H, 4H)

    def step(t, carry):
        h, c = carry
        row = pl.multiple_of(t * Bp, Bp)
        g = xp_scr[pl.ds(row, Bp), :] + jnp.dot(h, whh,
                                                preferred_element_type=jnp.float32)
        i = jax.nn.sigmoid(g[:, 0:H])
        f = jax.nn.sigmoid(g[:, H:2 * H])
        gg = jnp.tanh(g[:, 2 * H:3 * H])
        o = jax.nn.sigmoid(g[:, 3 * H:4 * H])
        c = f * c + i * gg
        h = o * jnp.tanh(c)
        return h, c

    h0 = jnp.zeros((Bp, H), jnp.float32)
    c0 = jnp.zeros((Bp, H), jnp.float32)
    h, _ = lax.fori_loop(0, T, step, (h0, c0), unroll=True)
    hn_ref[0] = h.astype(hn_ref.dtype)


def lstm_bidir_last_hidden(p, x_note):
    """nn.LSTM(batch_first=True, bidirectional=True): returns cat([h_n[0], h_n[1]], -1)."""
    B, T, I = x_note.shape
    H = p["w_hh_f"].shape[1]
    Bp = _round_up(B, 8)

    xp = jnp.zeros((Bp, T, I), jnp.float32).at[:B].set(x_note.astype(jnp.float32))
    x_fwd = jnp.transpose(xp, (1, 0, 2)).reshape(T * Bp, I)          # time-major rows
    x_bwd = jnp.transpose(xp[:, ::-1, :], (1, 0, 2)).reshape(T * Bp, I)
    x_dirs = jnp.stack([x_fwd, x_bwd], axis=0)                       # (2, T*Bp, I)

    wih = jnp.stack([p["w_ih_f"].T, p["w_ih_b"].T], axis=0)          # (2, I, 4H)
    whh = jnp.stack([p["w_hh_f"].T, p["w_hh_b"].T], axis=0)          # (2, H, 4H)
    bias = jnp.stack([(p["b_ih_f"] + p["b_hh_f"]).reshape(1, 4 * H),
                      (p["b_ih_b"] + p["b_hh_b"]).reshape(1, 4 * H)], axis=0)

    hn = pl.pallas_call(
        functools.partial(_lstm_dir_kernel, T, Bp),
        out_shape=jax.ShapeDtypeStruct((2, Bp, H), jnp.float32),
        grid_spec=pltpu.PrefetchScalarGridSpec(
            num_scalar_prefetch=0,
            grid=(2,),
            in_specs=[
                pl.BlockSpec((1, T * Bp, I), lambda d: (d, 0, 0)),
                pl.BlockSpec((1, I, 4 * H), lambda d: (d, 0, 0)),
                pl.BlockSpec((1, H, 4 * H), lambda d: (d, 0, 0)),
                pl.BlockSpec((1, 1, 4 * H), lambda d: (d, 0, 0)),
            ],
            out_specs=pl.BlockSpec((1, Bp, H), lambda d: (d, 0, 0)),
            scratch_shapes=[pltpu.VMEM((T * Bp, 4 * H), jnp.float32)],
        ),
        compiler_params=pltpu.CompilerParams(
            dimension_semantics=("parallel",)),
    )(x_dirs, wih, whh, bias)

    return jnp.concatenate([hn[0, :B], hn[1, :B]], axis=-1)          # (B, 2H)


# -----------------------------------------------------------------------------
# GRU-D: single-invocation kernel, hoisted non-recurrent projections
# -----------------------------------------------------------------------------
def _grud_kernel(T, Bp, x_ref, xl_ref, xm_ref, m_ref, d_ref,
                 gxw_ref, gxb_ref, wgh_ref, bgh_ref,
                 wxg_ref, wmg_ref, bg_ref, uzr_ref, uh_ref,
                 out_ref, pre_scr, dh_scr):
    H = uh_ref.shape[0]

    x = x_ref[...]            # (T*Bp, D)
    xl = xl_ref[...]
    xm = xm_ref[...]
    m = m_ref[...]
    d = d_ref[...]

    # gamma_x: FilterLinear masked by identity == diagonal -> elementwise (VPU).
    delta_x = jnp.exp(-jnp.maximum(0.0, d * gxw_ref[...] + gxb_ref[...]))
    x_hat = m * x + (1.0 - m) * (delta_x * xl + (1.0 - delta_x) * xm)

    # gamma_h decay, hoisted over all T as one matmul.
    dh_scr[...] = jnp.exp(-jnp.maximum(
        0.0,
        jnp.dot(d, wgh_ref[...], preferred_element_type=jnp.float32) + bgh_ref[...]))

    # Non-recurrent contributions of x_hat and mask to all three gates (z|r|h),
    # fused column-wise: no lane-axis concatenation, one big M = T*Bp matmul each.
    pre_scr[...] = (jnp.dot(x_hat, wxg_ref[...], preferred_element_type=jnp.float32)
                    + jnp.dot(m, wmg_ref[...], preferred_element_type=jnp.float32)
                    + bg_ref[...])

    uzr = uzr_ref[...]        # (H, 2H)  -> z|r
    uh = uh_ref[...]          # (H, H)

    # TODO(synk): recurrent_dropout1/2/3 are identity in eval mode; train-mode dropout
    # masks are not implemented.
    def step(t, h):
        row = pl.multiple_of(t * Bp, Bp)
        pre = pre_scr[pl.ds(row, Bp), :]                      # (Bp, 3H)
        h = dh_scr[pl.ds(row, Bp), :] * h                     # decayed hidden
        zr = jax.nn.sigmoid(pre[:, 0:2 * H]
                            + jnp.dot(h, uzr, preferred_element_type=jnp.float32))
        z = zr[:, 0:H]
        r = zr[:, H:2 * H]
        h_tilde = jnp.tanh(pre[:, 2 * H:3 * H]
                           + jnp.dot(r * h, uh, preferred_element_type=jnp.float32))
        h = (1.0 - z) * h + z * h_tilde
        out_ref[pl.ds(row, Bp), :] = h.astype(out_ref.dtype)
        return h

    h0 = jnp.zeros((Bp, H), jnp.float32)
    _ = lax.fori_loop(0, T, step, h0, unroll=True)


def grud_forward(p, X, X_last_obsv, Mask, Delta, X_mean):
    """GRU-D forward: inputs (B,T,D) [X_mean: (1,T,D)]; returns (outputs (B,T,H), h_last)."""
    B, T, D = X.shape
    H = p["Wz"].shape[0]
    Bp = _round_up(B, 8)

    def pad_tm(a):            # (B,T,D) -> (T*Bp, D), zero-padded batch, time-major rows
        ap = jnp.zeros((Bp, T, D), jnp.float32).at[:B].set(a.astype(jnp.float32))
        return jnp.transpose(ap, (1, 0, 2)).reshape(T * Bp, D)

    xs = pad_tm(X)
    xls = pad_tm(X_last_obsv)
    ms = pad_tm(Mask)
    dls = pad_tm(Delta)
    # X_mean is batch-broadcast; with a single kernel invocation it is DMA'd exactly once.
    xms = jnp.broadcast_to(jnp.transpose(X_mean.astype(jnp.float32), (1, 0, 2)),
                           (T, Bp, D)).reshape(T * Bp, D)

    # Weight packing (done once, outside the kernel): split the PyTorch-layout gate
    # weights (H, D+H+D) into x / h / mask row blocks and fuse the three gates
    # column-wise so the kernel never concatenates along the lane axis.
    WzT, WrT, WhT = p["Wz"].T, p["Wr"].T, p["Wh"].T                  # (2D+H, H)
    wxg = jnp.concatenate([WzT[:D], WrT[:D], WhT[:D]], axis=1)       # (D, 3H)
    wmg = jnp.concatenate([WzT[D + H:], WrT[D + H:], WhT[D + H:]], axis=1)
    bg = jnp.concatenate([p["bz"], p["br"], p["bh"]]).reshape(1, 3 * H)
    uzr = jnp.concatenate([WzT[D:D + H], WrT[D:D + H]], axis=1)      # (H, 2H)
    uh = WhT[D:D + H]                                                # (H, H)

    gxw = jnp.diagonal(p["Wgx"]).reshape(1, D)   # FilterLinear(identity mask) == diagonal
    gxb = p["bgx"].reshape(1, D)
    wgh = p["Wgh"].T                              # (D, H)
    bgh = p["bgh"].reshape(1, H)

    def full2d(shape):
        return pl.BlockSpec(shape, lambda i: (0, 0))

    out_tm = pl.pallas_call(
        functools.partial(_grud_kernel, T, Bp),
        out_shape=jax.ShapeDtypeStruct((T * Bp, H), jnp.float32),
        grid_spec=pltpu.PrefetchScalarGridSpec(
            num_scalar_prefetch=0,
            grid=(1,),
            in_specs=[full2d((T * Bp, D))] * 5 + [
                full2d((1, D)), full2d((1, D)),
                full2d((D, H)), full2d((1, H)),
                full2d((D, 3 * H)), full2d((D, 3 * H)), full2d((1, 3 * H)),
                full2d((H, 2 * H)), full2d((H, H)),
            ],
            out_specs=full2d((T * Bp, H)),
            scratch_shapes=[pltpu.VMEM((T * Bp, 3 * H), jnp.float32),
                            pltpu.VMEM((T * Bp, H), jnp.float32)],
        ),
        compiler_params=pltpu.CompilerParams(
            dimension_semantics=("arbitrary",)),
    )(xs, xls, xms, ms, dls,
      gxw, gxb, wgh, bgh, wxg, wmg, bg, uzr, uh)

    outputs = out_tm.reshape(T, Bp, H)[:, :B].transpose(1, 0, 2)     # (B, T, H)
    return outputs, outputs[:, -1, :]


# -----------------------------------------------------------------------------
# FC head: Linear -> tanh -> Linear (concat replaced by row-split partial matmuls)
# -----------------------------------------------------------------------------
def _fc_kernel(note_ref, hts_ref, w1a_ref, w1b_ref, b1_ref, w2_ref, b2_ref, out_ref):
    hidden = jnp.tanh(
        jnp.dot(note_ref[...], w1a_ref[...], preferred_element_type=jnp.float32)
        + jnp.dot(hts_ref[...], w1b_ref[...], preferred_element_type=jnp.float32)
        + b1_ref[...])
    out_ref[...] = (jnp.dot(hidden, w2_ref[...], preferred_element_type=jnp.float32)
                    + b2_ref[...]).astype(out_ref.dtype)


def fc_head(p, note_enc, h_ts):
    B, E2 = note_enc.shape
    Hts = h_ts.shape[1]
    E = E2 + Hts
    Y = p["W2"].shape[0]
    Bp = _round_up(B, 8)

    note_p = jnp.zeros((Bp, E2), jnp.float32).at[:B].set(note_enc)
    hts_p = jnp.zeros((Bp, Hts), jnp.float32).at[:B].set(h_ts)
    W1T = p["W1"].T                       # (E, E)
    w1a, w1b = W1T[:E2], W1T[E2:]
    b1 = p["b1"].reshape(1, E)
    w2 = p["W2"].T                        # (E, Y)
    b2 = p["b2"].reshape(1, Y)

    def full(shape):
        return pl.BlockSpec(shape, lambda i: (0, 0))

    logits = pl.pallas_call(
        _fc_kernel,
        out_shape=jax.ShapeDtypeStruct((Bp, Y), jnp.float32),
        grid_spec=pltpu.PrefetchScalarGridSpec(
            num_scalar_prefetch=0,
            grid=(1,),
            in_specs=[full((Bp, E2)), full((Bp, Hts)),
                      full((E2, E)), full((Hts, E)), full((1, E)),
                      full((E, Y)), full((1, Y))],
            out_specs=full((Bp, Y)),
        ),
        compiler_params=pltpu.CompilerParams(
            dimension_semantics=("arbitrary",)),
    )(note_p, hts_p, w1a, w1b, b1, w2, b2)
    return logits[:B]


# -----------------------------------------------------------------------------
# BimodalClassifier forward
# -----------------------------------------------------------------------------
def bimodal_classifier_forward(params, x_note, x_ts):
    note_enc = lstm_bidir_last_hidden(params["lstm"], x_note)        # (B, 2*H_txt)
    # TODO(synk): nn.Dropout layers are identity in eval mode; train-mode dropout is
    # not implemented.
    x = x_ts.astype(jnp.float32)
    mask = x[:, :, 0::3]
    meas = x[:, :, 1::3]
    tim = x[:, :, 2::3]
    _, h_ts = grud_forward(params["grud"], meas, meas, mask, tim, params["x_mean"])
    return fc_head(params["fc"], note_enc, h_ts)


# -----------------------------------------------------------------------------
# Parameter init (mirrors PyTorch reset_parameters) and pure-JAX references
# -----------------------------------------------------------------------------
def init_params(key, input_txt_size, input_ts_size, hidden_size_txt, hidden_size_ts,
                Y, step_ts):
    keys = iter(jax.random.split(key, 32))

    def unif(k, shape, bound):
        return jax.random.uniform(k, shape, jnp.float32, -bound, bound)

    Ht, It = hidden_size_txt, input_txt_size
    s = 1.0 / math.sqrt(Ht)
    lstm = dict(
        w_ih_f=unif(next(keys), (4 * Ht, It), s), w_hh_f=unif(next(keys), (4 * Ht, Ht), s),
        b_ih_f=unif(next(keys), (4 * Ht,), s), b_hh_f=unif(next(keys), (4 * Ht,), s),
        w_ih_b=unif(next(keys), (4 * Ht, It), s), w_hh_b=unif(next(keys), (4 * Ht, Ht), s),
        b_ih_b=unif(next(keys), (4 * Ht,), s), b_hh_b=unif(next(keys), (4 * Ht,), s),
    )

    D, Hs = input_ts_size, hidden_size_ts
    comb = 2 * D + Hs
    sc, sd = 1.0 / math.sqrt(comb), 1.0 / math.sqrt(D)
    grud = dict(
        Wz=unif(next(keys), (Hs, comb), sc), bz=unif(next(keys), (Hs,), sc),
        Wr=unif(next(keys), (Hs, comb), sc), br=unif(next(keys), (Hs,), sc),
        Wh=unif(next(keys), (Hs, comb), sc), bh=unif(next(keys), (Hs,), sc),
        Wgx=unif(next(keys), (D, D), sd), bgx=unif(next(keys), (D,), sd),
        Wgh=unif(next(keys), (Hs, D), sd), bgh=unif(next(keys), (Hs,), sd),
    )

    E = 2 * Ht + Hs
    se = 1.0 / math.sqrt(E)
    fc = dict(W1=unif(next(keys), (E, E), se), b1=unif(next(keys), (E,), se),
              W2=unif(next(keys), (Y, E), se), b2=unif(next(keys), (Y,), se))

    x_mean = jax.random.normal(next(keys), (1, step_ts, D), jnp.float32)
    return dict(lstm=lstm, grud=grud, fc=fc, x_mean=x_mean)


def lstm_reference(p, x_note):
    B, T, _ = x_note.shape
    H = p["w_hh_f"].shape[1]
    xf = x_note.astype(jnp.float32)

    def run(x_seq, w_ih, w_hh, b_ih, b_hh):
        h = jnp.zeros((B, H), jnp.float32)
        c = jnp.zeros((B, H), jnp.float32)
        for t in range(x_seq.shape[1]):
            g = x_seq[:, t] @ w_ih.T + b_ih + h @ w_hh.T + b_hh
            i = jax.nn.sigmoid(g[:, 0:H])
            f = jax.nn.sigmoid(g[:, H:2 * H])
            gg = jnp.tanh(g[:, 2 * H:3 * H])
            o = jax.nn.sigmoid(g[:, 3 * H:4 * H])
            c = f * c + i * gg
            h = o * jnp.tanh(c)
        return h

    h_f = run(xf, p["w_ih_f"], p["w_hh_f"], p["b_ih_f"], p["b_hh_f"])
    h_b = run(xf[:, ::-1], p["w_ih_b"], p["w_hh_b"], p["b_ih_b"], p["b_hh_b"])
    return jnp.concatenate([h_f, h_b], axis=-1)


def grud_reference(p, X, X_last, Mask, Delta, X_mean):
    B, T, D = X.shape
    H = p["Wz"].shape[0]
    eyeD = jnp.eye(D, dtype=jnp.float32)
    h = jnp.zeros((B, H), jnp.float32)
    outs = []
    for i in range(T):
        xi, xl, m, d = X[:, i], X_last[:, i], Mask[:, i], Delta[:, i]
        xm = jnp.broadcast_to(X_mean[:, i], (B, D))
        delta_x = jnp.exp(-jnp.maximum(0.0, d @ (eyeD * p["Wgx"]).T + p["bgx"]))
        x_hat = m * xi + (1 - m) * (delta_x * xl + (1 - delta_x) * xm)
        delta_h = jnp.exp(-jnp.maximum(0.0, d @ p["Wgh"].T + p["bgh"]))
        h = delta_h * h
        comb = jnp.concatenate([x_hat, h, m], axis=1)
        z = jax.nn.sigmoid(comb @ p["Wz"].T + p["bz"])
        r = jax.nn.sigmoid(comb @ p["Wr"].T + p["br"])
        comb3 = jnp.concatenate([x_hat, r * h, m], axis=1)
        h_tilde = jnp.tanh(comb3 @ p["Wh"].T + p["bh"])
        h = (1 - z) * h + z * h_tilde
        outs.append(h)
    outputs = jnp.stack(outs, axis=1)
    return outputs, outputs[:, -1, :]


def bimodal_reference(params, x_note, x_ts):
    note_enc = lstm_reference(params["lstm"], x_note)
    x = x_ts.astype(jnp.float32)
    mask, meas, tim = x[:, :, 0::3], x[:, :, 1::3], x[:, :, 2::3]
    _, h_ts = grud_reference(params["grud"], meas, meas, mask, tim, params["x_mean"])
    fp = params["fc"]
    xcat = jnp.concatenate([note_enc, h_ts], axis=-1)
    hidden = jnp.tanh(xcat @ fp["W1"].T + fp["b1"])
    return hidden @ fp["W2"].T + fp["b2"]


if __name__ == "__main__":
    B = 4
    T_txt, I_txt, H_txt = 10, 16, 32
    T_ts, D_ts, H_ts = 6, 8, 32
    Y = 2

    key = jax.random.PRNGKey(0)
    k_par, k_note, k_ts = jax.random.split(key, 3)
    params = init_params(k_par, I_txt, D_ts, H_txt, H_ts, Y, T_ts)

    x_note = jax.random.normal(k_note, (B, T_txt, I_txt), jnp.float32)
    # x_ts packs (mask, measurement, time) interleaved along the feature axis.
    k_m, k_v, k_t = jax.random.split(k_ts, 3)
    mask = (jax.random.uniform(k_m, (B, T_ts, D_ts)) > 0.5).astype(jnp.float32)
    meas = jax.random.normal(k_v, (B, T_ts, D_ts), jnp.float32)
    tim = jax.random.uniform(k_t, (B, T_ts, D_ts), jnp.float32, 0.0, 2.0)
    x_ts = jnp.stack([mask, meas, tim], axis=-1).reshape(B, T_ts, 3 * D_ts)

    # Full BimodalClassifier forward through the Pallas kernels.
    logits = bimodal_classifier_forward(params, x_note, x_ts)
    jax.block_until_ready(logits)
    assert logits.shape == (B, Y)

    # Validate the GRU-D kernel on its own against the pure-JAX reference.
    grud_out, grud_last = grud_forward(params["grud"], meas, meas, mask, tim,
                                       params["x_mean"])
    ref_out, ref_last = grud_reference(params["grud"], meas, meas, mask, tim,
                                       params["x_mean"])
    assert grud_out.shape == (B, T_ts, H_ts)
    assert jnp.allclose(grud_out, ref_out, rtol=1e-3, atol=1e-4)
    assert jnp.allclose(grud_last, ref_last, rtol=1e-3, atol=1e-4)

    # Validate the full classifier against the pure-JAX reference.
    ref_logits = bimodal_reference(params, x_note, x_ts)
    assert jnp.allclose(logits, ref_logits, rtol=1e-3, atol=1e-4)

    print("KERNEL_OK")
</pallas_src>

<mosaic_0001>
module attributes {stable_mosaic.version = 11 : i64} {
  func.func @_lstm_dir_kernel(%arg0: i32, %arg1: memref<1x80x16xf32, #tpu.memory_space<vmem>>, %arg2: memref<1x16x128xf32, #tpu.memory_space<vmem>>, %arg3: memref<1x32x128xf32, #tpu.memory_space<vmem>>, %arg4: memref<1x1x128xf32, #tpu.memory_space<vmem>>, %arg5: memref<1x8x32xf32, #tpu.memory_space<vmem>>, %arg6: memref<80x128xf32, #tpu.memory_space<vmem>>) attributes {dimension_semantics = [#tpu.dimension_semantics<parallel>], iteration_bounds = array<i64: 2>, scalar_prefetch = 0 : i64, scratch_operands = 1 : i64, tpu.core_type = #tpu.core_type<tc>, window_params = [{transform_indices = @transform_0, window_bounds = array<i64: 1, 80, 16>}, {transform_indices = @transform_1, window_bounds = array<i64: 1, 16, 128>}, {transform_indices = @transform_2, window_bounds = array<i64: 1, 32, 128>}, {transform_indices = @transform_3, window_bounds = array<i64: 1, 1, 128>}, {transform_indices = @transform_4, window_bounds = array<i64: 1, 8, 32>}]} {
    %c0 = arith.constant 0 : index
    %c0_0 = arith.constant 0 : index
    %c0_1 = arith.constant 0 : index
    %0 = vector.load %arg1[%c0, %c0_0, %c0_1] : memref<1x80x16xf32, #tpu.memory_space<vmem>>, vector<1x80x16xf32>
    %1 = vector.shape_cast %0 : vector<1x80x16xf32> to vector<80x16xf32>
    %c0_2 = arith.constant 0 : index
    %c0_3 = arith.constant 0 : index
    %c0_4 = arith.constant 0 : index
    %2 = vector.load %arg2[%c0_2, %c0_3, %c0_4] : memref<1x16x128xf32, #tpu.memory_space<vmem>>, vector<1x16x128xf32>
    %3 = vector.shape_cast %2 : vector<1x16x128xf32> to vector<16x128xf32>
    %cst = arith.constant dense<0.000000e+00> : vector<80x128xf32>
    %4 = tpu.matmul %1, %3, %cst {dimension_numbers = #tpu.dot_dimension_numbers<[1], [0], [0], [1], [0, 0, 1, 1], [], []>} : vector<80x16xf32>, vector<16x128xf32>, vector<80x128xf32> -> vector<80x128xf32>
    %c0_5 = arith.constant 0 : index
    %c0_6 = arith.constant 0 : index
    %c0_7 = arith.constant 0 : index
    %5 = vector.load %arg4[%c0_5, %c0_6, %c0_7] : memref<1x1x128xf32, #tpu.memory_space<vmem>>, vector<1x1x128xf32>
    %6 = vector.shape_cast %5 : vector<1x1x128xf32> to vector<1x128xf32>
    %7 = vector.broadcast %6 : vector<1x128xf32> to vector<80x128xf32>
    %8 = arith.addf %4, %7 : vector<80x128xf32>
    %c0_8 = arith.constant 0 : index
    %c0_9 = arith.constant 0 : index
    %9 = vector.load %arg6[%c0_8, %c0_9] : memref<80x128xf32, #tpu.memory_space<vmem>>, vector<80x128xf32>
    tpu.vector_store %arg6[%c0_8, %c0_9], %8 {strides = array<i32>} : memref<80x128xf32, #tpu.memory_space<vmem>>, vector<80x128xf32>,
    %c0_10 = arith.constant 0 : index
    %c0_11 = arith.constant 0 : index
    %c0_12 = arith.constant 0 : index
    %10 = vector.load %arg3[%c0_10, %c0_11, %c0_12] : memref<1x32x128xf32, #tpu.memory_space<vmem>>, vector<1x32x128xf32>
    %11 = vector.shape_cast %10 : vector<1x32x128xf32> to vector<32x128xf32>
    %cst_13 = arith.constant 0.000000e+00 : f32
    %12 = vector.broadcast %cst_13 : f32 to vector<8x32xf32>
    %cst_14 = arith.constant 0.000000e+00 : f32
    %13 = vector.broadcast %cst_14 : f32 to vector<8x32xf32>
    %c0_i32 = arith.constant 0 : i32
    %c8_i32 = arith.constant 8 : i32
    %14 = arith.muli %c0_i32, %c8_i32 : i32
    %15 = tpu.assume_multiple %14, 8 : i32
    %16 = arith.index_cast %15 : i32 to index
    %c0_15 = arith.constant 0 : index
    %17 = vector.load %arg6[%16, %c0_15] : memref<80x128xf32, #tpu.memory_space<vmem>>, vector<8x128xf32>
    %cst_16 = arith.constant dense<0.000000e+00> : vector<8x128xf32>
    %18 = tpu.matmul %12, %11, %cst_16 {dimension_numbers = #tpu.dot_dimension_numbers<[1], [0], [0], [1], [0, 0, 1, 1], [], []>} : vector<8x32xf32>, vector<32x128xf32>, vector<8x128xf32> -> vector<8x128xf32>
    %19 = arith.addf %17, %18 : vector<8x128xf32>
    %20 = vector.extract_strided_slice %19 {offsets = [0, 0], sizes = [8, 32], strides = [1, 1]} : vector<8x128xf32> to vector<8x32xf32>
    %21 = arith.negf %20 : vector<8x32xf32>
    %22 = math.exp %21 : vector<8x32xf32>
    %cst_17 = arith.constant 1.000000e+00 : f32
    %23 = vector.broadcast %cst_17 : f32 to vector<8x32xf32>
    %24 = arith.addf %23, %22 : vector<8x32xf32>
    %25 = arith.divf %23, %24 : vector<8x32xf32>
    %26 = vector.extract_strided_slice %19 {offsets = [0, 32], sizes = [8, 32], strides = [1, 1]} : vector<8x128xf32> to vector<8x32xf32>
    %27 = arith.negf %26 : vector<8x32xf32>
    %28 = math.exp %27 : vector<8x32xf32>
    %cst_18 = arith.constant 1.000000e+00 : f32
    %29 = vector.broadcast %cst_18 : f32 to vector<8x32xf32>
    %30 = arith.addf %29, %28 : vector<8x32xf32>
    %31 = arith.divf %29, %30 : vector<8x32xf32>
    %32 = vector.extract_strided_slice %19 {offsets = [0, 64], sizes = [8, 32], strides = [1, 1]} : vector<8x128xf32> to vector<8x32xf32>
    %33 = math.tanh %32 : vector<8x32xf32>
    %34 = vector.extract_strided_slice %19 {offsets = [0, 96], sizes = [8, 32], strides = [1, 1]} : vector<8x128xf32> to vector<8x32xf32>
    %35 = arith.negf %34 : vector<8x32xf32>
    %36 = math.exp %35 : vector<8x32xf32>
    %cst_19 = arith.constant 1.000000e+00 : f32
    %37 = vector.broadcast %cst_19 : f32 to vector<8x32xf32>
    %38 = arith.addf %37, %36 : vector<8x32xf32>
    %39 = arith.divf %37, %38 : vector<8x32xf32>
    %40 = arith.mulf %31, %13 : vector<8x32xf32>
    %41 = arith.mulf %25, %33 : vector<8x32xf32>
    %42 = arith.addf %40, %41 : vector<8x32xf32>
    %43 = math.tanh %42 : vector<8x32xf32>
    %44 = arith.mulf %39, %43 : vector<8x32xf32>
    %c1_i32 = arith.constant 1 : i32
    %c8_i32_20 = arith.constant 8 : i32
    %45 = arith.muli %c1_i32, %c8_i32_20 : i32
    %46 = tpu.assume_multiple %45, 8 : i32
    %47 = arith.index_cast %46 : i32 to index
    %c0_21 = arith.constant 0 : index
    %48 = vector.load %arg6[%47, %c0_21] : memref<80x128xf32, #tpu.memory_space<vmem>>, vector<8x128xf32>
    %cst_22 = arith.constant dense<0.000000e+00> : vector<8x128xf32>
    %49 = tpu.matmul %44, %11, %cst_22 {dimension_numbers = #tpu.dot_dimension_numbers<[1], [0], [0], [1], [0, 0, 1, 1], [], []>} : vector<8x32xf32>, vector<32x128xf32>, vector<8x128xf32> -> vector<8x128xf32>
    %50 = arith.addf %48, %49 : vector<8x128xf32>
    %51 = vector.extract_strided_slice %50 {offsets = [0, 0], sizes = [8, 32], strides = [1, 1]} : vector<8x128xf32> to vector<8x32xf32>
    %52 = arith.negf %51 : vector<8x32xf32>
    %53 = math.exp %52 : vector<8x32xf32>
    %cst_23 = arith.constant 1.000000e+00 : f32
    %54 = vector.broadcast %cst_23 : f32 to vector<8x32xf32>
    %55 = arith.addf %54, %53 : vector<8x32xf32>
    %56 = arith.divf %54, %55 : vector<8x32xf32>
    %57 = vector.extract_strided_slice %50 {offsets = [0, 32], sizes = [8, 32], strides = [1, 1]} : vector<8x128xf32> to vector<8x32xf32>
    %58 = arith.negf %57 : vector<8x32xf32>
    %59 = math.exp %58 : vector<8x32xf32>
    %cst_24 = arith.constant 1.000000e+00 : f32
    %60 = vector.broadcast %cst_24 : f32 to vector<8x32xf32>
    %61 = arith.addf %60, %59 : vector<8x32xf32>
    %62 = arith.divf %60, %61 : vector<8x32xf32>
    %63 = vector.extract_strided_slice %50 {offsets = [0, 64], sizes = [8, 32], strides = [1, 1]} : vector<8x128xf32> to vector<8x32xf32>
    %64 = math.tanh %63 : vector<8x32xf32>
    %65 = vector.extract_strided_slice %50 {offsets = [0, 96], sizes = [8, 32], strides = [1, 1]} : vector<8x128xf32> to vector<8x32xf32>
    %66 = arith.negf %65 : vector<8x32xf32>
    %67 = math.exp %66 : vector<8x32xf32>
    %cst_25 = arith.constant 1.000000e+00 : f32
    %68 = vector.broadcast %cst_25 : f32 to vector<8x32xf32>
    %69 = arith.addf %68, %67 : vector<8x32xf32>
    %70 = arith.divf %68, %69 : vector<8x32xf32>
    %71 = arith.mulf %62, %42 : vector<8x32xf32>
    %72 = arith.mulf %56, %64 : vector<8x32xf32>
    %73 = arith.addf %71, %72 : vector<8x32xf32>
    %74 = math.tanh %73 : vector<8x32xf32>
    %75 = arith.mulf %70, %74 : vector<8x32xf32>
    %c2_i32 = arith.constant 2 : i32
    %c8_i32_26 = arith.constant 8 : i32
    %76 = arith.muli %c2_i32, %c8_i32_26 : i32
    %77 = tpu.assume_multiple %76, 8 : i32
    %78 = arith.index_cast %77 : i32 to index
    %c0_27 = arith.constant 0 : index
    %79 = vector.load %arg6[%78, %c0_27] : memref<80x128xf32, #tpu.memory_space<vmem>>, vector<8x128xf32>
    %cst_28 = arith.constant dense<0.000000e+00> : vector<8x128xf32>
    %80 = tpu.matmul %75, %11, %cst_28 {dimension_numbers = #tpu.dot_dimension_numbers<[1], [0], [0], [1], [0, 0, 1, 1], [], []>} : vector<8x32xf32>, vector<32x128xf32>, vector<8x128xf32> -> vector<8x128xf32>
    %81 = arith.addf %79, %80 : vector<8x128xf32>
    %82 = vector.extract_strided_slice %81 {offsets = [0, 0], sizes = [8, 32], strides = [1, 1]} : vector<8x128xf32> to vector<8x32xf32>
    %83 = arith.negf %82 : vector<8x32xf32>
    %84 = math.exp %83 : vector<8x32xf32>
    %cst_29 = arith.constant 1.000000e+00 : f32
    %85 = vector.broadcast %cst_29 : f32 to vector<8x32xf32>
    %86 = arith.addf %85, %84 : vector<8x32xf32>
    %87 = arith.divf %85, %86 : vector<8x32xf32>
    %88 = vector.extract_strided_slice %81 {offsets = [0, 32], sizes = [8, 32], strides = [1, 1]} : vector<8x128xf32> to vector<8x32xf32>
    %89 = arith.negf %88 : vector<8x32xf32>
    %90 = math.exp %89 : vector<8x32xf32>
    %cst_30 = arith.constant 1.000000e+00 : f32
    %91 = vector.broadcast %cst_30 : f32 to vector<8x32xf32>
    %92 = arith.addf %91, %90 : vector<8x32xf32>
    %93 = arith.divf %91, %92 : vector<8x32xf32>
    %94 = vector.extract_strided_slice %81 {offsets = [0, 64], sizes = [8, 32], strides = [1, 1]} : vector<8x128xf32> to vector<8x32xf32>
    %95 = math.tanh %94 : vector<8x32xf32>
    %96 = vector.extract_strided_slice %81 {offsets = [0, 96], sizes = [8, 32], strides = [1, 1]} : vector<8x128xf32> to vector<8x32xf32>
    %97 = arith.negf %96 : vector<8x32xf32>
    %98 = math.exp %97 : vector<8x32xf32>
    %cst_31 = arith.constant 1.000000e+00 : f32
    %99 = vector.broadcast %cst_31 : f32 to vector<8x32xf32>
    %100 = arith.addf %99, %98 : vector<8x32xf32>
    %101 = arith.divf %99, %100 : vector<8x32xf32>
    %102 = arith.mulf %93, %73 : vector<8x32xf32>
    %103 = arith.mulf %87, %95 : vector<8x32xf32>
    %104 = arith.addf %102, %103 : vector<8x32xf32>
    %105 = math.tanh %104 : vector<8x32xf32>
    %106 = arith.mulf %101, %105 : vector<8x32xf32>
    %c3_i32 = arith.constant 3 : i32
    %c8_i32_32 = arith.constant 8 : i32
    %107 = arith.muli %c3_i32, %c8_i32_32 : i32
    %108 = tpu.assume_multiple %107, 8 : i32
    %109 = arith.index_cast %108 : i32 to index
    %c0_33 = arith.constant 0 : index
    %110 = vector.load %arg6[%109, %c0_33] : memref<80x128xf32, #tpu.memory_space<vmem>>, vector<8x128xf32>
    %cst_34 = arith.constant dense<0.000000e+00> : vector<8x128xf32>
    %111 = tpu.matmul %106, %11, %cst_34 {dimension_numbers = #tpu.dot_dimension_numbers<[1], [0], [0], [1], [0, 0, 1, 1], [], []>} : vector<8x32xf32>, vector<32x128xf32>, vector<8x128xf32> -> vector<8x128xf32>
    %112 = arith.addf %110, %111 : vector<8x128xf32>
    %113 = vector.extract_strided_slice %112 {offsets = [0, 0], sizes = [8, 32], strides = [1, 1]} : vector<8x128xf32> to vector<8x32xf32>
    %114 = arith.negf %113 : vector<8x32xf32>
    %115 = math.exp %114 : vector<8x32xf32>
    %cst_35 = arith.constant 1.000000e+00 : f32
    %116 = vector.broadcast %cst_35 : f32 to vector<8x32xf32>
    %117 = arith.addf %116, %115 : vector<8x32xf32>
    %118 = arith.divf %116, %117 : vector<8x32xf32>
    %119 = vector.extract_strided_slice %112 {offsets = [0, 32], sizes = [8, 32], strides = [1, 1]} : vector<8x128xf32> to vector<8x32xf32>
    %120 = arith.negf %119 : vector<8x32xf32>
    %121 = math.exp %120 : vector<8x32xf32>
    %cst_36 = arith.constant 1.000000e+00 : f32
    %122 = vector.broadcast %cst_36 : f32 to vector<8x32xf32>
    %123 = arith.addf %122, %121 : vector<8x32xf32>
    %124 = arith.divf %122, %123 : vector<8x32xf32>
    %125 = vector.extract_strided_slice %112 {offsets = [0, 64], sizes = [8, 32], strides = [1, 1]} : vector<8x128xf32> to vector<8x32xf32>
    %126 = math.tanh %125 : vector<8x32xf32>
    %127 = vector.extract_strided_slice %112 {offsets = [0, 96], sizes = [8, 32], strides = [1, 1]} : vector<8x128xf32> to vector<8x32xf32>
    %128 = arith.negf %127 : vector<8x32xf32>
    %129 = math.exp %128 : vector<8x32xf32>
    %cst_37 = arith.constant 1.000000e+00 : f32
    %130 = vector.broadcast %cst_37 : f32 to vector<8x32xf32>
    %131 = arith.addf %130, %129 : vector<8x32xf32>
    %132 = arith.divf %130, %131 : vector<8x32xf32>
    %133 = arith.mulf %124, %104 : vector<8x32xf32>
    %134 = arith.mulf %118, %126 : vector<8x32xf32>
    %135 = arith.addf %133, %134 : vector<8x32xf32>
    %136 = math.tanh %135 : vector<8x32xf32>
    %137 = arith.mulf %132, %136 : vector<8x32xf32>
    %c4_i32 = arith.constant 4 : i32
    %c8_i32_38 = arith.constant 8 : i32
    %138 = arith.muli %c4_i32, %c8_i32_38 : i32
    %139 = tpu.assume_multiple %138, 8 : i32
    %140 = arith.index_cast %139 : i32 to index
    %c0_39 = arith.constant 0 : index
    %141 = vector.load %arg6[%140, %c0_39] : memref<80x128xf32, #tpu.memory_space<vmem>>, vector<8x128xf32>
    %cst_40 = arith.constant dense<0.000000e+00> : vector<8x128xf32>
    %142 = tpu.matmul %137, %11, %cst_40 {dimension_numbers = #tpu.dot_dimension_numbers<[1], [0], [0], [1], [0, 0, 1, 1], [], []>} : vector<8x32xf32>, vector<32x128xf32>, vector<8x128xf32> -> vector<8x128xf32>
    %143 = arith.addf %141, %142 : vector<8x128xf32>
    %144 = vector.extract_strided_slice %143 {offsets = [0, 0], sizes = [8, 32], strides = [1, 1]} : vector<8x128xf32> to vector<8x32xf32>
    %145 = arith.negf %144 : vector<8x32xf32>
    %146 = math.exp %145 : vector<8x32xf32>
    %cst_41 = arith.constant 1.000000e+00 : f32
    %147 = vector.broadcast %cst_41 : f32 to vector<8x32xf32>
    %148 = arith.addf %147, %146 : vector<8x32xf32>
    %149 = arith.divf %147, %148 : vector<8x32xf32>
    %150 = vector.extract_strided_slice %143 {offsets = [0, 32], sizes = [8, 32], strides = [1, 1]} : vector<8x128xf32> to vector<8x32xf32>
    %151 = arith.negf %150 : vector<8x32xf32>
    %152 = math.exp %151 : vector<8x32xf32>
    %cst_42 = arith.constant 1.000000e+00 : f32
    %153 = vector.broadcast %cst_42 : f32 to vector<8x32xf32>
    %154 = arith.addf %153, %152 : vector<8x32xf32>
    %155 = arith.divf %153, %154 : vector<8x32xf32>
    %156 = vector.extract_strided_slice %143 {offsets = [0, 64], sizes = [8, 32], strides = [1, 1]} : vector<8x128xf32> to vector<8x32xf32>
    %157 = math.tanh %156 : vector<8x32xf32>
    %158 = vector.extract_strided_slice %143 {offsets = [0, 96], sizes = [8, 32], strides = [1, 1]} : vector<8x128xf32> to vector<8x32xf32>
    %159 = arith.negf %158 : vector<8x32xf32>
    %160 = math.exp %159 : vector<8x32xf32>
    %cst_43 = arith.constant 1.000000e+00 : f32
    %161 = vector.broadcast %cst_43 : f32 to vector<8x32xf32>
    %162 = arith.addf %161, %160 : vector<8x32xf32>
    %163 = arith.divf %161, %162 : vector<8x32xf32>
    %164 = arith.mulf %155, %135 : vector<8x32xf32>
    %165 = arith.mulf %149, %157 : vector<8x32xf32>
    %166 = arith.addf %164, %165 : vector<8x32xf32>
    %167 = math.tanh %166 : vector<8x32xf32>
    %168 = arith.mulf %163, %167 : vector<8x32xf32>
    %c5_i32 = arith.constant 5 : i32
    %c8_i32_44 = arith.constant 8 : i32
    %169 = arith.muli %c5_i32, %c8_i32_44 : i32
    %170 = tpu.assume_multiple %169, 8 : i32
    %171 = arith.index_cast %170 : i32 to index
    %c0_45 = arith.constant 0 : index
    %172 = vector.load %arg6[%171, %c0_45] : memref<80x128xf32, #tpu.memory_space<vmem>>, vector<8x128xf32>
    %cst_46 = arith.constant dense<0.000000e+00> : vector<8x128xf32>
    %173 = tpu.matmul %168, %11, %cst_46 {dimension_numbers = #tpu.dot_dimension_numbers<[1], [0], [0], [1], [0, 0, 1, 1], [], []>} : vector<8x32xf32>, vector<32x128xf32>, vector<8x128xf32> -> vector<8x128xf32>
    %174 = arith.addf %172, %173 : vector<8x128xf32>
    %175 = vector.extract_strided_slice %174 {offsets = [0, 0], sizes = [8, 32], strides = [1, 1]} : vector<8x128xf32> to vector<8x32xf32>
    %176 = arith.negf %175 : vector<8x32xf32>
    %177 = math.exp %176 : vector<8x32xf32>
    %cst_47 = arith.constant 1.000000e+00 : f32
    %178 = vector.broadcast %cst_47 : f32 to vector<8x32xf32>
    %179 = arith.addf %178, %177 : vector<8x32xf32>
    %180 = arith.divf %178, %179 : vector<8x32xf32>
    %181 = vector.extract_strided_slice %174 {offsets = [0, 32], sizes = [8, 32], strides = [1, 1]} : vector<8x128xf32> to vector<8x32xf32>
    %182 = arith.negf %181 : vector<8x32xf32>
    %183 = math.exp %182 : vector<8x32xf32>
    %cst_48 = arith.constant 1.000000e+00 : f32
    %184 = vector.broadcast %cst_48 : f32 to vector<8x32xf32>
    %185 = arith.addf %184, %183 : vector<8x32xf32>
    %186 = arith.divf %184, %185 : vector<8x32xf32>
    %187 = vector.extract_strided_slice %174 {offsets = [0, 64], sizes = [8, 32], strides = [1, 1]} : vector<8x128xf32> to vector<8x32xf32>
    %188 = math.tanh %187 : vector<8x32xf32>
    %189 = vector.extract_strided_slice %174 {offsets = [0, 96], sizes = [8, 32], strides = [1, 1]} : vector<8x128xf32> to vector<8x32xf32>
    %190 = arith.negf %189 : vector<8x32xf32>
    %191 = math.exp %190 : vector<8x32xf32>
    %cst_49 = arith.constant 1.000000e+00 : f32
    %192 = vector.broadcast %cst_49 : f32 to vector<8x32xf32>
    %193 = arith.addf %192, %191 : vector<8x32xf32>
    %194 = arith.divf %192, %193 : vector<8x32xf32>
    %195 = arith.mulf %186, %166 : vector<8x32xf32>
    %196 = arith.mulf %180, %188 : vector<8x32xf32>
    %197 = arith.addf %195, %196 : vector<8x32xf32>
    %198 = math.tanh %197 : vector<8x32xf32>
    %199 = arith.mulf %194, %198 : vector<8x32xf32>
    %c6_i32 = arith.constant 6 : i32
    %c8_i32_50 = arith.constant 8 : i32
    %200 = arith.muli %c6_i32, %c8_i32_50 : i32
    %201 = tpu.assume_multiple %200, 8 : i32
    %202 = arith.index_cast %201 : i32 to index
    %c0_51 = arith.constant 0 : index
    %203 = vector.load %arg6[%202, %c0_51] : memref<80x128xf32, #tpu.memory_space<vmem>>, vector<8x128xf32>
    %cst_52 = arith.constant dense<0.000000e+00> : vector<8x128xf32>
    %204 = tpu.matmul %199, %11, %cst_52 {dimension_numbers = #tpu.dot_dimension_numbers<[1], [0], [0], [1], [0, 0, 1, 1], [], []>} : vector<8x32xf32>, vector<32x128xf32>, vector<8x128xf32> -> vector<8x128xf32>
    %205 = arith.addf %203, %204 : vector<8x128xf32>
    %206 = vector.extract_strided_slice %205 {offsets = [0, 0], sizes = [8, 32], strides = [1, 1]} : vector<8x128xf32> to vector<8x32xf32>
    %207 = arith.negf %206 : vector<8x32xf32>
    %208 = math.exp %207 : vector<8x32xf32>
    %cst_53 = arith.constant 1.000000e+00 : f32
    %209 = vector.broadcast %cst_53 : f32 to vector<8x32xf32>
    %210 = arith.addf %209, %208 : vector<8x32xf32>
    %211 = arith.divf %209, %210 : vector<8x32xf32>
    %212 = vector.extract_strided_slice %205 {offsets = [0, 32], sizes = [8, 32], strides = [1, 1]} : vector<8x128xf32> to vector<8x32xf32>
    %213 = arith.negf %212 : vector<8x32xf32>
    %214 = math.exp %213 : vector<8x32xf32>
    %cst_54 = arith.constant 1.000000e+00 : f32
    %215 = vector.broadcast %cst_54 : f32 to vector<8x32xf32>
    %216 = arith.addf %215, %214 : vector<8x32xf32>
    %217 = arith.divf %215, %216 : vector<8x32xf32>
    %218 = vector.extract_strided_slice %205 {offsets = [0, 64], sizes = [8, 32], strides = [1, 1]} : vector<8x128xf32> to vector<8x32xf32>
    %219 = math.tanh %218 : vector<8x32xf32>
    %220 = vector.extract_strided_slice %205 {offsets = [0, 96], sizes = [8, 32], strides = [1, 1]} : vector<8x128xf32> to vector<8x32xf32>
    %221 = arith.negf %220 : vector<8x32xf32>
    %222 = math.exp %221 : vector<8x32xf32>
    %cst_55 = arith.constant 1.000000e+00 : f32
    %223 = vector.broadcast %cst_55 : f32 to vector<8x32xf32>
    %224 = arith.addf %223, %222 : vector<8x32xf32>
    %225 = arith.divf %223, %224 : vector<8x32xf32>
    %226 = arith.mulf %217, %197 : vector<8x32xf32>
    %227 = arith.mulf %211, %219 : vector<8x32xf32>
    %228 = arith.addf %226, %227 : vector<8x32xf32>
    %229 = math.tanh %228 : vector<8x32xf32>
    %230 = arith.mulf %225, %229 : vector<8x32xf32>
    %c7_i32 = arith.constant 7 : i32
    %c8_i32_56 = arith.constant 8 : i32
    %231 = arith.muli %c7_i32, %c8_i32_56 : i32
    %232 = tpu.assume_multiple %231, 8 : i32
    %233 = arith.index_cast %232 : i32 to index
    %c0_57 = arith.constant 0 : index
    %234 = vector.load %arg6[%233, %c0_57] : memref<80x128xf32, #tpu.memory_space<vmem>>, vector<8x128xf32>
    %cst_58 = arith.constant dense<0.000000e+00> : vector<8x128xf32>
    %235 = tpu.matmul %230, %11, %cst_58 {dimension_numbers = #tpu.dot_dimension_numbers<[1], [0], [0], [1], [0, 0, 1, 1], [], []>} : vector<8x32xf32>, vector<32x128xf32>, vector<8x128xf32> -> vector<8x128xf32>
    %236 = arith.addf %234, %235 : vector<8x128xf32>
    %237 = vector.extract_strided_slice %236 {offsets = [0, 0], sizes = [8, 32], strides = [1, 1]} : vector<8x128xf32> to vector<8x32xf32>
    %238 = arith.negf %237 : vector<8x32xf32>
    %239 = math.exp %238 : vector<8x32xf32>
    %cst_59 = arith.constant 1.000000e+00 : f32
    %240 = vector.broadcast %cst_59 : f32 to vector<8x32xf32>
    %241 = arith.addf %240, %239 : vector<8x32xf32>
    %242 = arith.divf %240, %241 : vector<8x32xf32>
    %243 = vector.extract_strided_slice %236 {offsets = [0, 32], sizes = [8, 32], strides = [1, 1]} : vector<8x128xf32> to vector<8x32xf32>
    %244 = arith.negf %243 : vector<8x32xf32>
    %245 = math.exp %244 : vector<8x32xf32>
    %cst_60 = arith.constant 1.000000e+00 : f32
    %246 = vector.broadcast %cst_60 : f32 to vector<8x32xf32>
    %247 = arith.addf %246, %245 : vector<8x32xf32>
    %248 = arith.divf %246, %247 : vector<8x32xf32>
    %249 = vector.extract_strided_slice %236 {offsets = [0, 64], sizes = [8, 32], strides = [1, 1]} : vector<8x128xf32> to vector<8x32xf32>
    %250 = math.tanh %249 : vector<8x32xf32>
    %251 = vector.extract_strided_slice %236 {offsets = [0, 96], sizes = [8, 32], strides = [1, 1]} : vector<8x128xf32> to vector<8x32xf32>
    %252 = arith.negf %251 : vector<8x32xf32>
    %253 = math.exp %252 : vector<8x32xf32>
    %cst_61 = arith.constant 1.000000e+00 : f32
    %254 = vector.broadcast %cst_61 : f32 to vector<8x32xf32>
    %255 = arith.addf %254, %253 : vector<8x32xf32>
    %256 = arith.divf %254, %255 : vector<8x32xf32>
    %257 = arith.mulf %248, %228 : vector<8x32xf32>
    %258 = arith.mulf %242, %250 : vector<8x32xf32>
    %259 = arith.addf %257, %258 : vector<8x32xf32>
    %260 = math.tanh %259 : vector<8x32xf32>
    %261 = arith.mulf %256, %260 : vector<8x32xf32>
    %c8_i32_62 = arith.constant 8 : i32
    %c8_i32_63 = arith.constant 8 : i32
    %262 = arith.muli %c8_i32_62, %c8_i32_63 : i32
    %263 = tpu.assume_multiple %262, 8 : i32
    %264 = arith.index_cast %263 : i32 to index
    %c0_64 = arith.constant 0 : index
    %265 = vector.load %arg6[%264, %c0_64] : memref<80x128xf32, #tpu.memory_space<vmem>>, vector<8x128xf32>
    %cst_65 = arith.constant dense<0.000000e+00> : vector<8x128xf32>
    %266 = tpu.matmul %261, %11, %cst_65 {dimension_numbers = #tpu.dot_dimension_numbers<[1], [0], [0], [1], [0, 0, 1, 1], [], []>} : vector<8x32xf32>, vector<32x128xf32>, vector<8x128xf32> -> vector<8x128xf32>
    %267 = arith.addf %265, %266 : vector<8x128xf32>
    %268 = vector.extract_strided_slice %267 {offsets = [0, 0], sizes = [8, 32], strides = [1, 1]} : vector<8x128xf32> to vector<8x32xf32>
    %269 = arith.negf %268 : vector<8x32xf32>
    %270 = math.exp %269 : vector<8x32xf32>
    %cst_66 = arith.constant 1.000000e+00 : f32
    %271 = vector.broadcast %cst_66 : f32 to vector<8x32xf32>
    %272 = arith.addf %271, %270 : vector<8x32xf32>
    %273 = arith.divf %271, %272 : vector<8x32xf32>
    %274 = vector.extract_strided_slice %267 {offsets = [0, 32], sizes = [8, 32], strides = [1, 1]} : vector<8x128xf32> to vector<8x32xf32>
    %275 = arith.negf %274 : vector<8x32xf32>
    %276 = math.exp %275 : vector<8x32xf32>
    %cst_67 = arith.constant 1.000000e+00 : f32
    %277 = vector.broadcast %cst_67 : f32 to vector<8x32xf32>
    %278 = arith.addf %277, %276 : vector<8x32xf32>
    %279 = arith.divf %277, %278 : vector<8x32xf32>
    %280 = vector.extract_strided_slice %267 {offsets = [0, 64], sizes = [8, 32], strides = [1, 1]} : vector<8x128xf32> to vector<8x32xf32>
    %281 = math.tanh %280 : vector<8x32xf32>
    %282 = vector.extract_strided_slice %267 {offsets = [0, 96], sizes = [8, 32], strides = [1, 1]} : vector<8x128xf32> to vector<8x32xf32>
    %283 = arith.negf %282 : vector<8x32xf32>
    %284 = math.exp %283 : vector<8x32xf32>
    %cst_68 = arith.constant 1.000000e+00 : f32
    %285 = vector.broadcast %cst_68 : f32 to vector<8x32xf32>
    %286 = arith.addf %285, %284 : vector<8x32xf32>
    %287 = arith.divf %285, %286 : vector<8x32xf32>
    %288 = arith.mulf %279, %259 : vector<8x32xf32>
    %289 = arith.mulf %273, %281 : vector<8x32xf32>
    %290 = arith.addf %288, %289 : vector<8x32xf32>
    %291 = math.tanh %290 : vector<8x32xf32>
    %292 = arith.mulf %287, %291 : vector<8x32xf32>
    %c9_i32 = arith.constant 9 : i32
    %c8_i32_69 = arith.constant 8 : i32
    %293 = arith.muli %c9_i32, %c8_i32_69 : i32
    %294 = tpu.assume_multiple %293, 8 : i32
    %295 = arith.index_cast %294 : i32 to index
    %c0_70 = arith.constant 0 : index
    %296 = vector.load %arg6[%295, %c0_70] : memref<80x128xf32, #tpu.memory_space<vmem>>, vector<8x128xf32>
    %cst_71 = arith.constant dense<0.000000e+00> : vector<8x128xf32>
    %297 = tpu.matmul %292, %11, %cst_71 {dimension_numbers = #tpu.dot_dimension_numbers<[1], [0], [0], [1], [0, 0, 1, 1], [], []>} : vector<8x32xf32>, vector<32x128xf32>, vector<8x128xf32> -> vector<8x128xf32>
    %298 = arith.addf %296, %297 : vector<8x128xf32>
    %299 = vector.extract_strided_slice %298 {offsets = [0, 0], sizes = [8, 32], strides = [1, 1]} : vector<8x128xf32> to vector<8x32xf32>
    %300 = arith.negf %299 : vector<8x32xf32>
    %301 = math.exp %300 : vector<8x32xf32>
    %cst_72 = arith.constant 1.000000e+00 : f32
    %302 = vector.broadcast %cst_72 : f32 to vector<8x32xf32>
    %303 = arith.addf %302, %301 : vector<8x32xf32>
    %304 = arith.divf %302, %303 : vector<8x32xf32>
    %305 = vector.extract_strided_slice %298 {offsets = [0, 32], sizes = [8, 32], strides = [1, 1]} : vector<8x128xf32> to vector<8x32xf32>
    %306 = arith.negf %305 : vector<8x32xf32>
    %307 = math.exp %306 : vector<8x32xf32>
    %cst_73 = arith.constant 1.000000e+00 : f32
    %308 = vector.broadcast %cst_73 : f32 to vector<8x32xf32>
    %309 = arith.addf %308, %307 : vector<8x32xf32>
    %310 = arith.divf %308, %309 : vector<8x32xf32>
    %311 = vector.extract_strided_slice %298 {offsets = [0, 64], sizes = [8, 32], strides = [1, 1]} : vector<8x128xf32> to vector<8x32xf32>
    %312 = math.tanh %311 : vector<8x32xf32>
    %313 = vector.extract_strided_slice %298 {offsets = [0, 96], sizes = [8, 32], strides = [1, 1]} : vector<8x128xf32> to vector<8x32xf32>
    %314 = arith.negf %313 : vector<8x32xf32>
    %315 = math.exp %314 : vector<8x32xf32>
    %cst_74 = arith.constant 1.000000e+00 : f32
    %316 = vector.broadcast %cst_74 : f32 to vector<8x32xf32>
    %317 = arith.addf %316, %315 : vector<8x32xf32>
    %318 = arith.divf %316, %317 : vector<8x32xf32>
    %319 = arith.mulf %310, %290 : vector<8x32xf32>
    %320 = arith.mulf %304, %312 : vector<8x32xf32>
    %321 = arith.addf %319, %320 : vector<8x32xf32>
    %322 = math.tanh %321 : vector<8x32xf32>
    %323 = arith.mulf %318, %322 : vector<8x32xf32>
    %c10_i32 = arith.constant 10 : i32
    %c0_75 = arith.constant 0 : index
    %c0_76 = arith.constant 0 : index
    %c0_77 = arith.constant 0 : index
    %324 = vector.load %arg5[%c0_75, %c0_76, %c0_77] : memref<1x8x32xf32, #tpu.memory_space<vmem>>, vector<1x8x32xf32>
    %325 = vector.shape_cast %324 : vector<1x8x32xf32> to vector<8x32xf32>
    %326 = vector.shape_cast %323 : vector<8x32xf32> to vector<1x8x32xf32>
    tpu.vector_store %arg5[%c0_75, %c0_76, %c0_77], %326 {strides = array<i32>} : memref<1x8x32xf32, #tpu.memory_space<vmem>>, vector<1x8x32xf32>,
    return
  }
  func.func @transform_0(%arg0: i32) -> (i32, i32, i32) {
    %c0_i32 = arith.constant 0 : i32
    %c0_i32_0 = arith.constant 0 : i32
    %c0_i32_1 = arith.constant 0 : i32
    return %arg0, %c0_i32, %c0_i32_0 : i32, i32, i32
  }
  func.func @transform_1(%arg0: i32) -> (i32, i32, i32) {
    %c0_i32 = arith.constant 0 : i32
    %c0_i32_0 = arith.constant 0 : i32
    %c0_i32_1 = arith.constant 0 : i32
    return %arg0, %c0_i32, %c0_i32_0 : i32, i32, i32
  }
  func.func @transform_2(%arg0: i32) -> (i32, i32, i32) {
    %c0_i32 = arith.constant 0 : i32
    %c0_i32_0 = arith.constant 0 : i32
    %c0_i32_1 = arith.constant 0 : i32
    return %arg0, %c0_i32, %c0_i32_0 : i32, i32, i32
  }
  func.func @transform_3(%arg0: i32) -> (i32, i32, i32) {
    %c0_i32 = arith.constant 0 : i32
    %c0_i32_0 = arith.constant 0 : i32
    %c0_i32_1 = arith.constant 0 : i32
    return %arg0, %c0_i32, %c0_i32_0 : i32, i32, i32
  }
  func.func @transform_4(%arg0: i32) -> (i32, i32, i32) {
    %c0_i32 = arith.constant 0 : i32
    %c0_i32_0 = arith.constant 0 : i32
    %c0_i32_1 = arith.constant 0 : i32
    return %arg0, %c0_i32, %c0_i32_0 : i32, i32, i32
  }
}

</mosaic_0001>

<bundles_post_ra>
// kernel: tpu_custom_call.1
= control target key start
LH: loop header
LB: loop body
LE: loop exit
PB: predicated region body
PF: predicated region fallthrough
CT: control target
= control target key end

     0   :  { %9 = vsyncpa [#allocation4], 0  ;;  %s2361_s0 = inlined_call_operand.vmem [shape: f32[2,80,16], index: 0, kind: input, shape index: {}]   ;;  %s2362_s1 = inlined_call_operand.vmem [shape: f32[2,16,128], index: 1, kind: input, shape index: {}]   ;;  %s2363_s2 = inlined_call_operand.vmem [shape: f32[2,32,128], index: 2, kind: input, shape index: {}]   ;;  %s2364_s3 = inlined_call_operand.vmem [shape: f32[2,1,128], index: 3, kind: input, shape index: {}]   ;;  %s2365_s4 = inlined_call_operand.hbm [shape: f32[2,8,32], index: 4, kind: output, shape index: {}]  }
   0x1   :  { %11 = vsyncpa [#allocation4 + $0x1], 0  ;;  %s2079_s15 = smov 0   ;;  %s2081_s16 = smov 0  }
   0x2   :  { %s2083_s17 = smov 0   ;;  %s2085_s18 = smov 0  }
   0x3 LB: > { %s2100_s19 = sadd.s32 4294967295, %s2046_s18   ;;  %s1558_s20 = sadd.s32 4294967294, %s2046_s18   ;;  %s2046_s18 = sphi %s2085_s18, %s2371_s18   ;;  %s2042_s17 = sphi %s2083_s17, %s2370_s17   ;;  %s2038_s16 = sphi %s2081_s16, %s2369_s16   ;;  %s2034_s15 = sphi %s2079_s15, %s2368_s15  }
   0x4   : > { %s2104_s21 = sadd.s32 1, %s2046_s18   ;;  %s128_s22 = sadd.s32 1, %s2042_s17 }
   0x5   : > { %s125_s23 = ssub.s32 %s2046_s18, %s2104_s21  ;;  %p138_p0 = scmp.ne.s32.totalorder %s2042_s17, %s2038_s16 }
   0x6   : > { %p126_p1 = scmp.eq.s32.totalorder %s125_s23, 0  ;;  %p139_p2 = scmp.eq.s32.totalorder %s2100_s19, 1 }
   0x7   : > { %p144_p3 = scmp.ne.s32.totalorder %s2038_s16, %s2034_s15  ;;  %p145_p4 = scmp.eq.s32.totalorder %s1558_s20, 1 }
   0x8   : > { %s2115_s24 = scalar_select %p126_p1, %s2042_s17, %s128_s22  }
   0x9   : > { %p2117_p5 = por %p139_p2, %p138_p0  ;;  %p2121_p6 = por %p145_p4, %p144_p3 }
   0xa   : > { %p1561_p7 = scmp.ge.s32.totalorder %s2046_s18, 1  ;;  %p193_p8 = scmp.lt.s32.totalorder %s2046_s18, 3 }
   0xc   : > { %p194_p9 = pnand %p1561_p7, %p193_p8 }
   0xd   : > { %p232_p10 = scmp.lt.s32.totalorder (!%p194_p9), %s2100_s19, 1  ;;  %v2048_v0 = vmov (!%p194_p9), 0.0|0.0   ;;  %vm2049_vm0 = vmmov (!%p194_p9), 0   ;;  %v2050_v1 = vmov (!%p194_p9), 0.0   ;;  %vm269_vm1 = vcmask (!%p194_p9), 130048   ;;  %s2051_s23 = smov (!%p194_p9), 64  }
   0xe   : > { %197 = sbr.rel (%p194_p9) target bundleno = 7070 (0x1b9e), region = 36  ;;  %1799 = vmatprep.subr.bf16.mxu1 (!%p194_p9), %v2048_v0  ;;  %1693 = vmatprep.mubr.msk.f32.mxu1 (!%p194_p9), %vm2049_vm0, %v2050_v1  ;;  %vm430_vm2 = vcmask (!%p194_p9), 261120   ;;  %s1599_s30 = sshll.u32 (!%p194_p9), %s2100_s19, 7 }
   0xf   : > { %s2318_s9 = scalar_lea.hbm (!%p194_p9), %s2365_s4, %s1599_s30 }
  0x15   : > { %s2132_s27 = scalar_select %p232_p10, %s2100_s19, 1 }
  0x16   : > { %s2053_s19 = smov [#allocation3]  }
  0x17   : > { %s1859_s28 = smul.u32 80, %s2132_s27  ;;  %s1602_s29 = sshll.u32 %s2132_s27, 4 }
  0x18   : > { %s241_s6 = scalar_lea.vmem %s2362_s1, %s1602_s29  ;;  %s1603_s7 = sshll.u32 %s2132_s27, 5 }
  0x19   : > { %s2143_s10 = scalar_lea.vmem %s2361_s0, %s1859_s28  ;;  %s246_s13 = scalar_lea.vmem %s2363_s2, %s1603_s7  ;;  %v260_v2 = vld [vmem:[%s241_s6] sm:$0xff]  ;;  %v261_v3 = vld [vmem:[%s241_s6 + $0x8] sm:$0xff] }
  0x1a   : > { %v1795_v4 = vpack.c.bf16 %v261_v3, %v260_v2  ;;  %v425_v5 = vld [vmem:[%s246_s13] sm:$0xff]  ;;  %v426_v6 = vld [vmem:[%s246_s13 + $0x8] sm:$0xff]  ;;  %v427_v7 = vld [vmem:[%s246_s13 + $0x10] sm:$0xff]  ;;  %s249_s22 = scalar_lea.vmem %s2364_s3, %s2132_s27  ;;  %s2052_s27 = smov 32  }
  0x1b   : > { %v428_v8 = vld [vmem:[%s246_s13 + $0x18] sm:$0xff]  ;;  %v2148_v9 = vpack.c.bf16 %v426_v6, %v425_v5  ;;  %v250_v10 = vld [vmem:[%s2143_s10] sm:$0xff]  ;;  %v251_v12 = vld [vmem:[%s2143_s10 + $0x8] sm:$0xff]  ;;  %s229_s28 = sand.u32 1, %s2038_s16   ;;  %s1988_s12 = sshll.u32 %s2053_s19, 4  ;;  %s1989_s12 = int_to_ptr.vmem [resolvable:$false] %s1988_s12 }
  0x1c   : > { %1796 = vmatprep.subr.bf16.mxu0 %v1795_v4  ;;  %1670 = vmatprep.mubr.msk.f32.mxu0 %vm269_vm1, %v250_v10  ;;  %v2152_v11 = vpack.c.bf16 %v428_v8, %v427_v7  ;;  %v2176_v13 = vld [vmem:[%s249_s22] ss:$0 sm:$0xff]  ;;  %v252_v48 = vld [vmem:[%s2143_s10 + $0x10] sm:$0xff]  ;;  %v253_v49 = vld [vmem:[%s2143_s10 + $0x18] sm:$0xff]  ;;  %s1562_s29 = sshll.u32 %s229_s28, 3  ;;  %s1990_s13 = scalar_lea.vmem %s1989_s12, 256 }
  0x1d   : > { %1801 = vmatpush3.bf16.msra.mxu1 %v2148_v9  ;;  %1798 = vmatpush3.bf16.msra.mxu0 %v1795_v4  ;;  %v254_v50 = vld [vmem:[%s2143_s10 + $0x20] sm:$0xff]  ;;  %v255_v51 = vld [vmem:[%s2143_s10 + $0x28] sm:$0xff]  ;;  %v256_v52 = vld [vmem:[%s2143_s10 + $0x30] sm:$0xff]  ;;  %s231_s5 = scalar_lea.vmem [#allocation3], %s1562_s29 }
  0x1e   : > { %1802 = vmatprep.subr.bf16.mxu1 %v2048_v0  ;;  %1811 = vmatprep.subr.bf16.mxu0 %v2048_v0  ;;  %v257_v53 = vld [vmem:[%s2143_s10 + $0x38] sm:$0xff]  ;;  %v258_v54 = vld [vmem:[%s2143_s10 + $0x40] sm:$0xff]  ;;  %v259_v56 = vld [vmem:[%s2143_s10 + $0x48] sm:$0xff]  ;;  %s1466_s6 = sshll.u32 %s231_s5, 4  ;;  %s1453_s10 = scalar_lea.sflag [#allocation4], %s229_s28  ;;  %s2320_s6 = int_to_ptr.vmem [resolvable:$true] %s1466_s6 }
  0x1f   : > { %s1984_s11 = scalar_lea.vmem %s2320_s6, 128  ;;  %p1991_p0 = scmp.lt.s32.totalorder %s2320_s6, %s1989_s12 }
  0x20   : > { %1671 = vmatmul.mubr.msk.f32.vlgmr.msra.gmra.mrb[0].mxu0 %vm269_vm1, %v251_v12  ;;  %p1985_p11 = scmp.ne.s32.totalorder %s2320_s6, %s1984_s11  ;;  %p1992_p1 = scmp.lt.s32.totalorder %s1990_s13, %s1984_s11 }
  0x21   : > { %1804 = vmatpush3.bf16.msra.mxu1 %v2152_v11  ;;  %1813 = vmatpush3.bf16.msra.mxu0 %v2148_v9 }
  0x22   : > { %1805 = vmatprep.subr.bf16.mxu1 %v2048_v0  ;;  %1814 = vmatprep.subr.bf16.mxu0 %v2048_v0  ;;  %p1986_p12 = pnand %p1985_p11, %p2117_p5  ;;  %p1993_p2 = por %p1992_p1, %p1991_p0 }
  0x23   : > { %1673 = vmatprep.mubr.msk.f32.mxu0 %vm269_vm1, %v252_v48 }
  0x24   : > { %1694 = vmatmul.mubr.f32.vlgmr.msra.gmra.mrb[0].mxu1 %v2050_v1  ;;  %1674 = vmatmul.mubr.msk.f32.gmra.mrb[2].mxu0 %vm269_vm1, %v253_v49  ;;  %p1987_p13 = pneg %p1986_p12 }
  0x25   : > { %1807 = vmatpush3.bf16.msra.mxu1 %v2148_v9  ;;  %1704 = vmatprep.mubr.msk.f32.mxu1 %vm2049_vm0, %v2050_v1 }
  0x26   : > { %1808 = vmatprep.subr.bf16.mxu1 %v2048_v0  ;;  %1816 = vmatpush3.bf16.msra.mxu0 %v2152_v11  ;;  %p1994_p3 = pnand %p1993_p2, %p1987_p13 }
  0x27   : > { %1823 = vmatprep.subr.bf16.mxu0 %v2048_v0  ;;  %1676 = vmatprep.mubr.msk.f32.mxu0 %vm269_vm1, %v254_v50 }
  0x28   : > { %1677 = vmatmul.mubr.msk.f32.gmra.mrb[4].mxu0 %vm269_vm1, %v255_v51 }
  0x29   : > { %1810 = vmatpush3.bf16.msra.mxu1 %v2152_v11  ;;  %1679 = vmatprep.mubr.msk.f32.mxu0 %vm269_vm1, %v256_v52 }
  0x2a   : > { %1817 = vmatprep.subr.bf16.mxu1 %v2048_v0 }
  0x2c   : > { %1680 = vmatmul.mubr.msk.f32.gmra.mrb[6].mxu0 %vm269_vm1, %v257_v53 }
  0x2d   : > { %1682 = vmatprep.mubr.msk.f32.mxu0 %vm269_vm1, %v258_v54 }
  0x30   : > { %1683 = vmatmul.mubr.msk.f32.gmra.mrb[8].mxu0 %vm269_vm1, %v259_v56 }
  0x31   : > { %1715 = vmatprep.mubr.msk.f32.mxu0 %vm2049_vm0, %v2050_v1 }
  0xf3   : > { %v1672_v14 = vpop.f32.mrb[0].mxu0 }
  0xf4   : > { %v366_v15 = vpop.f32.mrb[1].mxu0  ;;  %v372_v34 = vadd.f32 %v1672_v14, %v2176_v13 }
  0xf5   : > { %v367_v16 = vadd.f32 %v2176_v13, %v366_v15 }
  0xf7   : > { %v500_v17 = vpop.f32.mrb[0].mxu1  ;;  %v1675_v59 = vpop.f32.mrb[2].mxu0 }
  0xf8   : > { %v504_v18 = vadd.f32 %v500_v17, %v367_v16  ;;  %v1695_v19 = vpop.f32.mrb[1].mxu1  ;;  %v376_v60 = vpop.f32.mrb[3].mxu0 }
  0xf9   : > { %v377_v6 = vadd.f32 %v2176_v13, %v376_v60 }
  0xfa   : > { %1904 = vtanh.f32 %v504_v18  ;;  %v1579_v21 = vmul.f32 -1.442695, %v504_v18 }
  0xfb   : > { %v2213_v61 = vpop.f32.mrb[4].mxu0 }
  0xfc   : > { %1906 = vpow2.f32 %v1579_v21  ;;  %v2215_v62 = vpop.f32.mrb[5].mxu0 }
  0xff   : > { %v2217_v63 = vpop.f32.mrb[6].mxu0 }
 0x100   : > { %v2219_v2 = vpop.f32.mrb[7].mxu0 }
 0x103   : > { %v2221_v3 = vpop.f32.mrb[8].mxu0 }
 0x104   : > { %v1905_v20 = vpop.eup %1904  ;;  %v2223_v4 = vpop.f32.mrb[9].mxu0 }
 0x105   : > { %514 = vrot.lane.b32.xlu0 %v1905_v20, %s2051_s23 }
 0x106   : > { %v1907_v22 = vpop.eup %1906 }
 0x107   : > { %v508_v23 = vadd.f32 1.0, %v1907_v22 }
 0x109   : > { %1908 = vrcp.f32 %v508_v23 }
 0x113   : > { %v1909_v24 = vpop.eup %1908 }
 0x114   : > { %v512_v27 = vmul.f32 0.0, %v1909_v24 }
 0x177   : > { %v515_v25 = vpop.permute.xlu0 %514 }
 0x178   : > { %v517_v26 = vmul.f32 %v1909_v24, %v515_v25 }
 0x17a   : > { %519 = vrot.lane.b32.xlu0 %v517_v26, %s2052_s27 }
 0x1ec   : > { %v520_v28 = vpop.permute.xlu0 %519 }
 0x1ed   : > { %v522_v29 = vadd.f32 %v520_v28, %v512_v27  ;;  %v382_v27 = vadd.f32 %v1675_v59, %v2176_v13 }
 0x1ef   : > { %1910 = vtanh.f32 %v522_v29 }
 0x1f9   : > { %v1911_v30 = vpop.eup %1910 }
 0x1fa   : > { %525 = vrot.lane.b32.xlu1 %v1911_v30, %s2051_s23 }
 0x26c   : > { %v526_v31 = vpop.permute.xlu1 %525 }
 0x26d   : > { %v528_v32 = vmul.f32 %v1909_v24, %v526_v31 }
 0x26f   : > { %532 = vrot.lane.b32.xlu1 %v528_v32, %s2052_s27 }
 0x2e1   : > { %v533_v33 = vpop.permute.xlu1 %532 }
 0x2e2   : > { %1705 = vmatmul.mubr.msk.f32.vlgmr.msra.gmra.mrb[2].mxu1 %vm430_vm2, %v533_v33 }
 0x2e3   : > { %1819 = vmatpush3.bf16.msra.mxu1 %v2148_v9  ;;  %1726 = vmatprep.mubr.msk.f32.mxu1 %vm2049_vm0, %v2050_v1 }
 0x2e4   : > { %1820 = vmatprep.subr.bf16.mxu1 %v2048_v0 }
 0x2e7   : > { %1822 = vmatpush3.bf16.msra.mxu1 %v2152_v11 }
 0x2e8   : > { %1829 = vmatprep.subr.bf16.mxu1 %v2048_v0 }
 0x3b5   : > { %v602_v35 = vpop.f32.mrb[2].mxu1 }
 0x3b6   : > { %v606_v36 = vadd.f32 %v602_v35, %v372_v34  ;;  %v1706_v37 = vpop.f32.mrb[3].mxu1 }
 0x3b8   : > { %1912 = vtanh.f32 %v606_v36  ;;  %v1581_v39 = vmul.f32 -1.442695, %v606_v36 }
 0x3ba   : > { %1914 = vpow2.f32 %v1581_v39 }
 0x3c2   : > { %v1913_v38 = vpop.eup %1912 }
 0x3c3   : > { %616 = vrot.lane.b32.xlu0 %v1913_v38, %s2051_s23 }
 0x3c4   : > { %v1915_v40 = vpop.eup %1914 }
 0x3c5   : > { %v610_v41 = vadd.f32 1.0, %v1915_v40 }
 0x3c7   : > { %1916 = vrcp.f32 %v610_v41 }
 0x3d1   : > { %v1917_v42 = vpop.eup %1916 }
 0x3d2   : > { %v614_v45 = vmul.f32 %v1917_v42, %v522_v29 }
 0x435   : > { %v617_v43 = vpop.permute.xlu0 %616 }
 0x436   : > { %v619_v44 = vmul.f32 %v1917_v42, %v617_v43 }
 0x438   : > { %621 = vrot.lane.b32.xlu1 %v619_v44, %s2052_s27 }
 0x4aa   : > { %v622_v46 = vpop.permute.xlu1 %621 }
 0x4ab   : > { %v624_v47 = vadd.f32 %v622_v46, %v614_v45  ;;  %v387_v45 = vadd.f32 %v2176_v13, %v2215_v62 }
 0x4ad   : > { %1918 = vtanh.f32 %v624_v47 }
 0x4b7   : > { %v1919_v55 = vpop.eup %1918 }
 0x4b8   : > { %627 = vrot.lane.b32.xlu0 %v1919_v55, %s2051_s23 }
 0x52a   : > { %v628_v57 = vpop.permute.xlu0 %627 }
 0x52b   : > { %v630_v58 = vmul.f32 %v1917_v42, %v628_v57 }
 0x52d   : > { %634 = vrot.lane.b32.xlu1 %v630_v58, %s2052_s27 }
 0x59f   : > { %v635_v5 = vpop.permute.xlu1 %634 }
 0x5a0   : > { %1716 = vmatmul.mubr.msk.f32.vlgmr.msra.gmra.mrb[10].mxu0 %vm430_vm2, %v635_v5 }
 0x5a1   : > { %1825 = vmatpush3.bf16.msra.mxu0 %v2148_v9  ;;  %1737 = vmatprep.mubr.msk.f32.mxu0 %vm2049_vm0, %v2050_v1 }
 0x5a2   : > { %1826 = vmatprep.subr.bf16.mxu0 %v2048_v0 }
 0x5a5   : > { %1828 = vmatpush3.bf16.msra.mxu0 %v2152_v11 }
 0x5a6   : > { %1835 = vmatprep.subr.bf16.mxu0 %v2048_v0 }
 0x673   : > { %v704_v7 = vpop.f32.mrb[10].mxu0 }
 0x674   : > { %v708_v8 = vadd.f32 %v704_v7, %v377_v6  ;;  %v1717_v10 = vpop.f32.mrb[11].mxu0  ;;  %v392_v6 = vadd.f32 %v2213_v61, %v2176_v13 }
 0x676   : > { %1920 = vtanh.f32 %v708_v8  ;;  %v1583_v14 = vmul.f32 -1.442695, %v708_v8 }
 0x678   : > { %1922 = vpow2.f32 %v1583_v14 }
 0x680   : > { %v1921_v12 = vpop.eup %1920 }
 0x681   : > { %718 = vrot.lane.b32.xlu0 %v1921_v12, %s2051_s23 }
 0x682   : > { %v1923_v15 = vpop.eup %1922 }
 0x683   : > { %v712_v16 = vadd.f32 1.0, %v1923_v15 }
 0x685   : > { %1924 = vrcp.f32 %v712_v16 }
 0x68f   : > { %v1925_v17 = vpop.eup %1924 }
 0x690   : > { %v716_v20 = vmul.f32 %v1925_v17, %v624_v47 }
 0x6f3   : > { %v719_v18 = vpop.permute.xlu0 %718 }
 0x6f4   : > { %v721_v19 = vmul.f32 %v1925_v17, %v719_v18 }
 0x6f6   : > { %723 = vrot.lane.b32.xlu1 %v721_v19, %s2052_s27 }
 0x768   : > { %v724_v21 = vpop.permute.xlu1 %723 }
 0x769   : > { %v726_v22 = vadd.f32 %v724_v21, %v716_v20 }
 0x76b   : > { %1926 = vtanh.f32 %v726_v22 }
 0x775   : > { %v1927_v23 = vpop.eup %1926 }
 0x776   : > { %729 = vrot.lane.b32.xlu0 %v1927_v23, %s2051_s23 }
 0x7e8   : > { %v730_v24 = vpop.permute.xlu0 %729 }
 0x7e9   : > { %v732_v25 = vmul.f32 %v1925_v17, %v730_v24 }
 0x7eb   : > { %736 = vrot.lane.b32.xlu1 %v732_v25, %s2052_s27 }
 0x85d   : > { %v737_v26 = vpop.permute.xlu1 %736 }
 0x85e   : > { %1727 = vmatmul.mubr.msk.f32.vlgmr.msra.gmra.mrb[4].mxu1 %vm430_vm2, %v737_v26  ;;  %v397_v26 = vadd.f32 %v2176_v13, %v2219_v2 }
 0x85f   : > { %1831 = vmatpush3.bf16.msra.mxu1 %v2148_v9  ;;  %1748 = vmatprep.mubr.msk.f32.mxu1 %vm2049_vm0, %v2050_v1 }
 0x860   : > { %1832 = vmatprep.subr.bf16.mxu1 %v2048_v0 }
 0x863   : > { %1834 = vmatpush3.bf16.msra.mxu1 %v2152_v11 }
 0x864   : > { %1841 = vmatprep.subr.bf16.mxu1 %v2048_v0 }
 0x931   : > { %v806_v28 = vpop.f32.mrb[4].mxu1 }
 0x932   : > { %v810_v29 = vadd.f32 %v806_v28, %v382_v27  ;;  %v1728_v30 = vpop.f32.mrb[5].mxu1 }
 0x934   : > { %1928 = vtanh.f32 %v810_v29  ;;  %v1585_v32 = vmul.f32 -1.442695, %v810_v29 }
 0x936   : > { %1930 = vpow2.f32 %v1585_v32 }
 0x93e   : > { %v1929_v31 = vpop.eup %1928 }
 0x93f   : > { %820 = vrot.lane.b32.xlu0 %v1929_v31, %s2051_s23 }
 0x940   : > { %v1931_v33 = vpop.eup %1930 }
 0x941   : > { %v814_v34 = vadd.f32 1.0, %v1931_v33 }
 0x943   : > { %1932 = vrcp.f32 %v814_v34 }
 0x94d   : > { %v1933_v35 = vpop.eup %1932 }
 0x94e   : > { %v818_v38 = vmul.f32 %v1933_v35, %v726_v22 }
 0x9b1   : > { %v821_v36 = vpop.permute.xlu0 %820 }
 0x9b2   : > { %v823_v37 = vmul.f32 %v1933_v35, %v821_v36 }
 0x9b4   : > { %825 = vrot.lane.b32.xlu1 %v823_v37, %s2052_s27 }
 0xa26   : > { %v826_v39 = vpop.permute.xlu1 %825 }
 0xa27   : > { %v828_v40 = vadd.f32 %v826_v39, %v818_v38 }
 0xa29   : > { %1934 = vtanh.f32 %v828_v40 }
 0xa33   : > { %v1935_v41 = vpop.eup %1934 }
 0xa34   : > { %831 = vrot.lane.b32.xlu0 %v1935_v41, %s2051_s23 }
 0xaa6   : > { %v832_v42 = vpop.permute.xlu0 %831 }
 0xaa7   : > { %v834_v43 = vmul.f32 %v1933_v35, %v832_v42 }
 0xaa9   : > { %838 = vrot.lane.b32.xlu1 %v834_v43, %s2052_s27  ;;  %v402_v43 = vadd.f32 %v2217_v63, %v2176_v13 }
 0xb1b   : > { %v839_v44 = vpop.permute.xlu1 %838 }
 0xb1c   : > { %1738 = vmatmul.mubr.msk.f32.vlgmr.msra.gmra.mrb[12].mxu0 %vm430_vm2, %v839_v44 }
 0xb1d   : > { %1837 = vmatpush3.bf16.msra.mxu0 %v2148_v9  ;;  %1759 = vmatprep.mubr.msk.f32.mxu0 %vm2049_vm0, %v2050_v1 }
 0xb1e   : > { %1838 = vmatprep.subr.bf16.mxu0 %v2048_v0 }
 0xb21   : > { %1840 = vmatpush3.bf16.msra.mxu0 %v2152_v11 }
 0xb22   : > { %1847 = vmatprep.subr.bf16.mxu0 %v2048_v0 }
 0xbef   : > { %v908_v46 = vpop.f32.mrb[12].mxu0 }
 0xbf0   : > { %v912_v47 = vadd.f32 %v908_v46, %v387_v45  ;;  %v1739_v48 = vpop.f32.mrb[13].mxu0 }
 0xbf2   : > { %1936 = vtanh.f32 %v912_v47  ;;  %v1587_v50 = vmul.f32 -1.442695, %v912_v47 }
 0xbf4   : > { %1938 = vpow2.f32 %v1587_v50 }
 0xbfc   : > { %v1937_v49 = vpop.eup %1936 }
 0xbfd   : > { %922 = vrot.lane.b32.xlu0 %v1937_v49, %s2051_s23 }
 0xbfe   : > { %v1939_v51 = vpop.eup %1938 }
 0xbff   : > { %v916_v52 = vadd.f32 1.0, %v1939_v51 }
 0xc01   : > { %1940 = vrcp.f32 %v916_v52 }
 0xc0b   : > { %v1941_v53 = vpop.eup %1940 }
 0xc0c   : > { %v920_v56 = vmul.f32 %v1941_v53, %v828_v40 }
 0xc6f   : > { %v923_v54 = vpop.permute.xlu0 %922 }
 0xc70   : > { %v925_v55 = vmul.f32 %v1941_v53, %v923_v54 }
 0xc72   : > { %927 = vrot.lane.b32.xlu1 %v925_v55, %s2052_s27 }
 0xce4   : > { %v928_v57 = vpop.permute.xlu1 %927 }
 0xce5   : > { %v930_v58 = vadd.f32 %v928_v57, %v920_v56  ;;  %v407_v56 = vadd.f32 %v2176_v13, %v2223_v4 }
 0xce7   : > { %1942 = vtanh.f32 %v930_v58 }
 0xcf1   : > { %v1943_v59 = vpop.eup %1942 }
 0xcf2   : > { %933 = vrot.lane.b32.xlu0 %v1943_v59, %s2051_s23 }
 0xd64   : > { %v934_v60 = vpop.permute.xlu0 %933 }
 0xd65   : > { %v936_v62 = vmul.f32 %v1941_v53, %v934_v60 }
 0xd67   : > { %940 = vrot.lane.b32.xlu1 %v936_v62, %s2052_s27 }
 0xdd9   : > { %v941_v5 = vpop.permute.xlu1 %940 }
 0xdda   : > { %1749 = vmatmul.mubr.msk.f32.vlgmr.msra.gmra.mrb[6].mxu1 %vm430_vm2, %v941_v5 }
 0xddb   : > { %1843 = vmatpush3.bf16.msra.mxu1 %v2148_v9  ;;  %1770 = vmatprep.mubr.msk.f32.mxu1 %vm2049_vm0, %v2050_v1 }
 0xddc   : > { %1844 = vmatprep.subr.bf16.mxu1 %v2048_v0 }
 0xddf   : > { %1846 = vmatpush3.bf16.msra.mxu1 %v2152_v11 }
 0xde0   : > { %1853 = vmatprep.subr.bf16.mxu1 %v2048_v0 }
 0xead   : > { %v1010_v7 = vpop.f32.mrb[6].mxu1 }
 0xeae   : > { %v1014_v8 = vadd.f32 %v1010_v7, %v392_v6  ;;  %v1750_v10 = vpop.f32.mrb[7].mxu1 }
 0xeb0   : > { %1944 = vtanh.f32 %v1014_v8  ;;  %v1589_v14 = vmul.f32 -1.442695, %v1014_v8 }
 0xeb2   : > { %1946 = vpow2.f32 %v1589_v14 }
 0xeba   : > { %v1945_v12 = vpop.eup %1944 }
 0xebb   : > { %1024 = vrot.lane.b32.xlu0 %v1945_v12, %s2051_s23 }
 0xebc   : > { %v1947_v15 = vpop.eup %1946 }
 0xebd   : > { %v1018_v16 = vadd.f32 1.0, %v1947_v15 }
 0xebf   : > { %1948 = vrcp.f32 %v1018_v16 }
 0xec9   : > { %v1949_v17 = vpop.eup %1948 }
 0xeca   : > { %v1022_v20 = vmul.f32 %v1949_v17, %v930_v58 }
 0xf2d   : > { %v1025_v18 = vpop.permute.xlu0 %1024 }
 0xf2e   : > { %v1027_v19 = vmul.f32 %v1949_v17, %v1025_v18 }
 0xf30   : > { %1029 = vrot.lane.b32.xlu1 %v1027_v19, %s2052_s27  ;;  %v412_v19 = vadd.f32 %v2221_v3, %v2176_v13 }
 0xfa2   : > { %v1030_v21 = vpop.permute.xlu1 %1029 }
 0xfa3   : > { %v1032_v61 = vadd.f32 %v1030_v21, %v1022_v20 }
 0xfa5   : > { %1950 = vtanh.f32 %v1032_v61 }
 0xfaf   : > { %v1951_v22 = vpop.eup %1950 }
 0xfb0   : > { %1035 = vrot.lane.b32.xlu0 %v1951_v22, %s2051_s23 }
0x1022   : > { %v1036_v23 = vpop.permute.xlu0 %1035 }
0x1023   : > { %v1038_v24 = vmul.f32 %v1949_v17, %v1036_v23 }
0x1025   : > { %1042 = vrot.lane.b32.xlu1 %v1038_v24, %s2052_s27 }
0x1097   : > { %v1043_v25 = vpop.permute.xlu1 %1042 }
0x1098   : > { %1760 = vmatmul.mubr.msk.f32.vlgmr.msra.gmra.mrb[14].mxu0 %vm430_vm2, %v1043_v25 }
0x1099   : > { %1849 = vmatpush3.bf16.msra.mxu0 %v2148_v9  ;;  %1781 = vmatprep.mubr.msk.f32.mxu0 %vm2049_vm0, %v2050_v1 }
0x109a   : > { %1850 = vmatprep.subr.bf16.mxu0 %v2048_v0 }
0x109d   : > { %1852 = vmatpush3.bf16.msra.mxu0 %v2152_v11 }
0x116b   : > { %v1112_v27 = vpop.f32.mrb[14].mxu0 }
0x116c   : > { %v1116_v28 = vadd.f32 %v1112_v27, %v397_v26  ;;  %v1761_v29 = vpop.f32.mrb[15].mxu0 }
0x116e   : > { %1952 = vtanh.f32 %v1116_v28  ;;  %v1591_v31 = vmul.f32 -1.442695, %v1116_v28 }
0x1170   : > { %1954 = vpow2.f32 %v1591_v31 }
0x1178   : > { %v1953_v30 = vpop.eup %1952 }
0x1179   : > { %1126 = vrot.lane.b32.xlu0 %v1953_v30, %s2051_s23 }
0x117a   : > { %v1955_v32 = vpop.eup %1954 }
0x117b   : > { %v1120_v33 = vadd.f32 1.0, %v1955_v32 }
0x117d   : > { %1956 = vrcp.f32 %v1120_v33 }
0x1187   : > { %v1957_v34 = vpop.eup %1956 }
0x1188   : > { %v1124_v37 = vmul.f32 %v1957_v34, %v1032_v61 }
0x11eb   : > { %v1127_v35 = vpop.permute.xlu0 %1126 }
0x11ec   : > { %v1129_v36 = vmul.f32 %v1957_v34, %v1127_v35 }
0x11ee   : > { %1131 = vrot.lane.b32.xlu1 %v1129_v36, %s2052_s27 }
0x1260   : > { %v1132_v38 = vpop.permute.xlu1 %1131 }
0x1261   : > { %v1134_v2 = vadd.f32 %v1132_v38, %v1124_v37 }
0x1263   : > { %1958 = vtanh.f32 %v1134_v2 }
0x126d   : > { %v1959_v39 = vpop.eup %1958 }
0x126e   : > { %1137 = vrot.lane.b32.xlu0 %v1959_v39, %s2051_s23 }
0x12e0   : > { %v1138_v40 = vpop.permute.xlu0 %1137 }
0x12e1   : > { %v1140_v41 = vmul.f32 %v1957_v34, %v1138_v40 }
0x12e3   : > { %1144 = vrot.lane.b32.xlu1 %v1140_v41, %s2052_s27 }
0x1355   : > { %v1145_v42 = vpop.permute.xlu1 %1144 }
0x1356   : > { %1771 = vmatmul.mubr.msk.f32.vlgmr.msra.gmra.mrb[8].mxu1 %vm430_vm2, %v1145_v42 }
0x1357   : > { %1855 = vmatpush3.bf16.msra.mxu1 %v2148_v9  ;;  %1792 = vmatprep.mubr.msk.f32.mxu1 %vm2049_vm0, %v2050_v1 }
0x1358   : > { %1856 = vmatprep.subr.bf16.mxu1 %v2048_v0 }
0x135b   : > { %1858 = vmatpush3.bf16.msra.mxu1 %v2152_v11 }
0x1429   : > { %v1214_v44 = vpop.f32.mrb[8].mxu1 }
0x142a   : > { %v1218_v45 = vadd.f32 %v1214_v44, %v402_v43  ;;  %v1772_v46 = vpop.f32.mrb[9].mxu1 }
0x142c   : > { %1960 = vtanh.f32 %v1218_v45  ;;  %v1593_v48 = vmul.f32 -1.442695, %v1218_v45 }
0x142e   : > { %1962 = vpow2.f32 %v1593_v48 }
0x1436   : > { %v1961_v47 = vpop.eup %1960 }
0x1437   : > { %1228 = vrot.lane.b32.xlu0 %v1961_v47, %s2051_s23 }
0x1438   : > { %v1963_v9 = vpop.eup %1962 }
0x1439   : > { %v1222_v49 = vadd.f32 1.0, %v1963_v9 }
0x143b   : > { %1964 = vrcp.f32 %v1222_v49 }
0x1445   : > { %v1965_v1 = vpop.eup %1964 }
0x1446   : > { %v1226_v11 = vmul.f32 %v1965_v1, %v1134_v2 }
0x14a9   : > { %v1229_v50 = vpop.permute.xlu0 %1228 }
0x14aa   : > { %v1231_v0 = vmul.f32 %v1965_v1, %v1229_v50 }
0x14ac   : > { %1233 = vrot.lane.b32.xlu1 %v1231_v0, %s2052_s27 }
0x151e   : > { %v1234_v51 = vpop.permute.xlu1 %1233 }
0x151f   : > { %v1236_v63 = vadd.f32 %v1234_v51, %v1226_v11 }
0x1521   : > { %1966 = vtanh.f32 %v1236_v63 }
0x152b   : > { %v1967_v52 = vpop.eup %1966 }
0x152c   : > { %1239 = vrot.lane.b32.xlu0 %v1967_v52, %s2051_s23 }
0x159e   : > { %v1240_v53 = vpop.permute.xlu0 %1239 }
0x159f   : > { %v1242_v54 = vmul.f32 %v1965_v1, %v1240_v53 }
0x15a1   : > { %1246 = vrot.lane.b32.xlu1 %v1242_v54, %s2052_s27 }
0x1613   : > { %v1247_v55 = vpop.permute.xlu1 %1246 }
0x1614   : > { %1782 = vmatmul.mubr.msk.f32.vlgmr.msra.gmra.mrb[16].mxu0 %vm430_vm2, %v1247_v55 }
0x16e7   : > { %v1316_v57 = vpop.f32.mrb[16].mxu0 }
0x16e8   : > { %v1320_v58 = vadd.f32 %v1316_v57, %v407_v56  ;;  %v1783_v59 = vpop.f32.mrb[17].mxu0 }
0x16ea   : > { %1968 = vtanh.f32 %v1320_v58  ;;  %v1595_v62 = vmul.f32 -1.442695, %v1320_v58 }
0x16ec   : > { %1970 = vpow2.f32 %v1595_v62 }
0x16f4   : > { %v1969_v60 = vpop.eup %1968 }
0x16f5   : > { %1330 = vrot.lane.b32.xlu0 %v1969_v60, %s2051_s23 }
0x16f6   : > { %v1971_v5 = vpop.eup %1970 }
0x16f7   : > { %v1324_v6 = vadd.f32 1.0, %v1971_v5 }
0x16f9   : > { %1972 = vrcp.f32 %v1324_v6 }
0x1703   : > { %v1973_v7 = vpop.eup %1972 }
0x1704   : > { %v1328_v12 = vmul.f32 %v1973_v7, %v1236_v63 }
0x1767   : > { %v1331_v8 = vpop.permute.xlu0 %1330 }
0x1768   : > { %v1333_v10 = vmul.f32 %v1973_v7, %v1331_v8 }
0x176a   : > { %1335 = vrot.lane.b32.xlu1 %v1333_v10, %s2052_s27 }
0x17dc   : > { %v1336_v14 = vpop.permute.xlu1 %1335 }
0x17dd   : > { %v1338_v4 = vadd.f32 %v1336_v14, %v1328_v12 }
0x17df   : > { %1974 = vtanh.f32 %v1338_v4 }
0x17e9   : > { %v1975_v15 = vpop.eup %1974 }
0x17ea   : > { %1341 = vrot.lane.b32.xlu0 %v1975_v15, %s2051_s23 }
0x185c   : > { %v1342_v16 = vpop.permute.xlu0 %1341 }
0x185d   : > { %v1344_v17 = vmul.f32 %v1973_v7, %v1342_v16 }
0x185f   : > { %1348 = vrot.lane.b32.xlu1 %v1344_v17, %s2052_s27 }
0x18d1   : > { %v1349_v18 = vpop.permute.xlu1 %1348 }
0x18d2   : > { %1793 = vmatmul.mubr.msk.f32.vlgmr.msra.gmra.mrb[10].mxu1 %vm430_vm2, %v1349_v18 }
0x19a5   : > { %v1418_v20 = vpop.f32.mrb[10].mxu1 }
0x19a6   : > { %v1422_v21 = vadd.f32 %v1418_v20, %v412_v19  ;;  %v1794_v61 = vpop.f32.mrb[11].mxu1 }
0x19a8   : > { %1976 = vtanh.f32 %v1422_v21  ;;  %v1597_v23 = vmul.f32 -1.442695, %v1422_v21 }
0x19aa   : > { %1978 = vpow2.f32 %v1597_v23 }
0x19b2   : > { %v1977_v22 = vpop.eup %1976 }
0x19b3   : > { %1432 = vrot.lane.b32.xlu0 %v1977_v22, %s2051_s23 }
0x19b4   : > { %v1979_v24 = vpop.eup %1978 }
0x19b5   : > { %v1426_v25 = vadd.f32 1.0, %v1979_v24 }
0x19b7   : > { %1980 = vrcp.f32 %v1426_v25 }
0x19c1   : > { %v1981_v26 = vpop.eup %1980 }
0x19c2   : > { %v1430_v13 = vmul.f32 %v1981_v26, %v1338_v4 }
0x1a25   : > { %v1433_v27 = vpop.permute.xlu0 %1432 }
0x1a26   : > { %v1435_v28 = vmul.f32 %v1981_v26, %v1433_v27 }
0x1a28   : > { %1437 = vrot.lane.b32.xlu1 %v1435_v28, %s2052_s27 }
0x1a9a   : > { %v1438_v3 = vpop.permute.xlu1 %1437 }
0x1a9b   : > { %v1440_v29 = vadd.f32 %v1438_v3, %v1430_v13 }
0x1a9d   : > { %1982 = vtanh.f32 %v1440_v29 }
0x1aa7   : > { %v1983_v30 = vpop.eup %1982 }
0x1aa8   : > { %1443 = vrot.lane.b32.xlu0 %v1983_v30, %s2051_s23 }
0x1b1a   : > { %v1444_v31 = vpop.permute.xlu0 %1443 }
0x1b1b   : > { %v1446_v32 = vmul.f32 %v1981_v26, %v1444_v31 }
0x1b1d   : > { %1448 = vrot.lane.b32.xlu1 %v1446_v32, %s2052_s27 }
0x1b8f   : > { %v1449_v33 = vpop.permute.xlu1 %1448 }
0x1b90   : > { %1451 = vst.msk [vmem:[%s231_s5] sm:$0xff] %vm430_vm2, %v1449_v33 }
0x1b91   : > { %1997 = shalt.err (!%p1994_p3)
}
0x1b92   : > { %s1998_s14 = scalar_lea.hbm %s2318_s9, 128  ;;  %s2002_s23 = scalar_lea.hbm %s2365_s4, 256 }
0x1b93   : > { %p1999_p4 = scmp.ne.s32.totalorder %s2318_s9, %s1998_s14  ;;  %p2003_p9 = scmp.lt.u32.totalorder %s2318_s9, %s2365_s4 }
0x1b94   : > { %p2004_p10 = scmp.lt.u32.totalorder %s2002_s23, %s1998_s14  ;;  %p2006_p12 = scmp.lt.u32.totalorder %s1998_s14, %s2318_s9 }
0x1b95   : > { %p2000_p7 = pnand %p1999_p4, %p2117_p5 }
0x1b96   : > { %p2005_p11 = por %p2004_p10, %p2003_p9 }
0x1b97   : > { %p2001_p8 = pneg %p2000_p7 }
0x1b98   : > { %p2007_p13 = por %p2006_p12, %p2005_p11 }
0x1b9a   : > { %p2008_p0 = pnand %p2007_p13, %p2001_p8 }
0x1b9c   : > { %2011 = shalt.err (!%p2008_p0)
}
0x1b9d   : > { %1860 = dma.vmem_to_hbm [thread:$0]  (%p2117_p5), %s2320_s6, 128, %s2318_s9, %s1453_s10  }
0x1b9e PF: > { %p1866_p1 = scmp.ge.s32.totalorder %s2046_s18, 2  ;;  %s1478_s29 = sand.u32 1, %s2034_s15  }
0x1b9f   : > { %s1479_s30 = scalar_lea.sflag [#allocation4], %s1478_s29 }
0x1ba0   : > { %p1863_p2 = pnand %p1866_p1, %p2121_p6 }
0x1ba2   : > { %2029 = dma.done.wait (!%p1863_p2), %s1479_s30, 128  }
0x1ba3   : > { %2031 = vsyncadd (!%p1863_p2), %s1479_s30, 4294967168  ;;  %p14_p3 = scmp.ge.s32.totalorder %s2104_s21, 4   ;;  %s2368_s15 = smov %s2038_s16 }
0x1ba4   : > { %s2369_s16 = smov %s2042_s17  ;;  %s2370_s17 = smov %s2115_s24 }
0x1ba5   : > { %s2371_s18 = smov %s2104_s21  ;;  %16 = sbr.rel (!%p14_p3) target bundleno = 3 (0x3), region = 89 }
0x1bac   :  { %1484 = vsyncpa [#allocation4], 1 }
0x1bad   :  { %1486 = vsyncpa [#allocation4 + $0x1], 1 }

</bundles_post_ra>
